<compile_context>
chip_gen: v7x
topology: tpu7x:2x2x1
jax: 0.10.0
libtpu: 0.0.40
codegen_flags: <defaults>
</compile_context>

<pallas_src>
import functools

import numpy as np
import jax
import jax.numpy as jnp
from jax.experimental import pallas as pl
from jax.experimental.pallas import tpu as pltpu


_CONV_CHANNELS = (16, 32, 64, 64)
_CONV_STRIDES = (2, 2, 2, 1)


def _conv_spatial(h, w):
    """Per-layer spatial sizes for the 4 convs (kernel 3, padding 1)."""
    hs, ws = [h], [w]
    for s in _CONV_STRIDES:
        hs.append((hs[-1] + 2 - 3) // s + 1)
        ws.append((ws[-1] + 2 - 3) // s + 1)
    return tuple(hs), tuple(ws)


def _pick_width_chunks(win, wout, cin, stride):
    """Partition a conv layer's output width into chunks.

    Each chunk's Toeplitz tap only carries the input columns that chunk can
    touch (a pure block partition of the full matmul), cutting the Toeplitz
    FLOP inflation from ~Win/3 to ~(wc*stride)/3.  Chunking is only used when
    the per-chunk MXU K stays >= 256 and the chunk is >= 4 output columns, so
    it is a no-op (one full-width chunk) at small shapes.
    Returns a tuple of (col_lo, col_hi, ow_lo, ow_hi) per chunk.
    """
    def build(ncw):
        wc = wout // ncw
        out = []
        for j in range(ncw):
            ow_lo, ow_hi = j * wc, (j + 1) * wc
            col_lo = max(0, ow_lo * stride - 1)            # width padding = 1
            col_hi = min(win, (ow_hi - 1) * stride + 2)
            out.append((col_lo, col_hi, ow_lo, ow_hi))
        return tuple(out)

    for ncw in range(wout, 1, -1):                         # most chunks first
        if wout % ncw:
            continue
        wc = wout // ncw
        if wc < 4:
            continue
        if ((wc - 1) * stride + 3) * cin < 256:            # keep MXU K healthy
            continue
        return build(ncw)
    return build(1)


# ----------------------------------------------------------------------------
# Fused Pallas kernel.
# ----------------------------------------------------------------------------
def _elu_f32(x):
    # ELU(alpha=1); exp(min(x,0)) - 1 has a known-good Mosaic lowering.
    return jnp.where(x > 0.0, x, jnp.exp(jnp.minimum(x, 0.0)) - 1.0)


def _encoder_kernel(*refs, tb, hs, ws, chans, strides, chunks, compute_dtype):
    """Whole encoder for one batch tile.

    x_ref: (H0, TB, W0*C0) -- row h holds the width*channel slab of image row
    h for every image in the batch tile (lane index = w*C + c).
    """
    n_tap = 3 * sum(len(c) for c in chunks)
    i = 0
    x_ref = refs[i]; i += 1
    tap_refs = refs[i:i + n_tap]; i += n_tap
    bias_refs = refs[i:i + 4]; i += 4
    fw_ref = refs[i]; i += 1
    fb_ref = refs[i]; i += 1
    o_ref = refs[i]; i += 1
    act_ref = refs[i]; i += 1     # stacked activations, reused in place
    lhs_ref = refs[i]; i += 1     # gathered LHS for the current height tap
    acc_ref = refs[i]; i += 1     # f32 accumulator for the current layer
    slab_ref = refs[i]; i += 1    # (TB, H4*W4*C4) flatten slab for the FC
    assert i == len(refs)

    tap_i = 0
    for li in range(4):
        hin, hout = hs[li], hs[li + 1]
        win, wout = ws[li], ws[li + 1]
        cin, cout = chans[li], chans[li + 1]
        s = strides[li]
        kf = win * cin
        nf = wout * cout
        mo = hout * tb                                   # stacked M dimension

        for kh in range(3):
            # ---- Gather the stacked LHS (M = Hout*TB) for this height tap.
            # Height padding / stride reduce to static row-block picks; padded
            # edges become zero row blocks.
            for oh in range(hout):
                ih = oh * s + kh - 1                     # height padding = 1
                r0, r1 = oh * tb, (oh + 1) * tb
                if ih < 0 or ih >= hin:
                    lhs_ref[r0:r1, 0:kf] = jnp.zeros((tb, kf), compute_dtype)
                elif li == 0:
                    lhs_ref[r0:r1, 0:kf] = x_ref[ih]
                else:
                    lhs_ref[r0:r1, 0:kf] = act_ref[ih * tb:(ih + 1) * tb, 0:kf]

            # ---- One MXU pass per width chunk (ncw == 1 unless the layer is
            # wide enough that de-inflating the Toeplitz pays off).  The MXU
            # accumulates the 3 height taps into the f32 VMEM accumulator.
            for (col_lo, col_hi, ow_lo, ow_hi) in chunks[li]:
                part = jnp.dot(lhs_ref[0:mo, col_lo * cin:col_hi * cin],
                               tap_refs[tap_i][...],
                               preferred_element_type=jnp.float32)
                n_lo, n_hi = ow_lo * cout, ow_hi * cout
                if kh == 0:
                    acc_ref[0:mo, n_lo:n_hi] = part
                else:
                    acc_ref[0:mo, n_lo:n_hi] += part
                tap_i += 1

        # ---- f32 bias + ELU, write back over the activation scratch (the
        # layer's own input rows are dead at this point, so in-place is safe).
        y = _elu_f32(acc_ref[0:mo, 0:nf] + bias_refs[li][...])
        act_ref[0:mo, 0:nf] = y.astype(compute_dtype)

    # ---- nn.Flatten() + nn.Linear as ONE matmul: repack the conv4 rows into
    # a (TB, H4*W4*C4) slab with lane-offset stores, then a single K=H4*W4*C4
    # dot against the pre-permuted (and lane-padded) FC weight.
    h4, w4, c4 = hs[4], ws[4], chans[4]
    wc4 = w4 * c4
    for hh in range(h4):
        slab_ref[:, hh * wc4:(hh + 1) * wc4] = act_ref[hh * tb:(hh + 1) * tb, 0:wc4]
    feat = jnp.dot(slab_ref[...], fw_ref[...], preferred_element_type=jnp.float32)
    o_ref[...] = (feat + fb_ref[...]).astype(o_ref.dtype)


# ----------------------------------------------------------------------------
# Wrapper: batch tiling, VMEM accounting, BlockSpecs.
# ----------------------------------------------------------------------------
def _full_spec(a):
    nd = a.ndim
    return pl.BlockSpec(a.shape, lambda i, nd=nd: (0,) * nd)


def _physical_vmem_bytes():
    try:
        return int(pltpu.get_tpu_info().vmem_capacity_bytes)
    except Exception:
        return 64 << 20          # conservative floor (v7x per-TensorCore VMEM)


def _vmem_need_bytes(tb, hs, ws, chans, cdt_size, fpad, weight_bytes):
    m_max = hs[1] * tb
    k_max = max(ws[i] * chans[i] for i in range(4))
    n_max = max(ws[i + 1] * chans[i + 1] for i in range(4))
    scratch = (m_max * n_max * cdt_size                         # act
               + m_max * k_max * cdt_size                       # gathered LHS
               + m_max * n_max * 4                              # f32 accumulator
               + tb * hs[4] * ws[4] * chans[4] * cdt_size)      # FC slab
    io = (2 * hs[0] * tb * ws[0] * chans[0] * cdt_size          # input, x2 buffers
          + 2 * tb * fpad * 4)                                  # output, x2 buffers
    return scratch + io + 2 * weight_bytes                      # weights counted x2


def _pick_batch_tile(batch, need_fn, budget):
    cands = []
    for tb in range(batch, 0, -1):
        if batch % tb:
            continue
        if tb != batch and tb % 8:
            continue                  # partial batch tiles must be sublane-aligned
        cands.append(tb)
    fitting = [tb for tb in cands if need_fn(tb) <= budget]
    pool = fitting if fitting else cands[-1:]   # last resort: smallest legal tile

    def score(tb):
        return (batch // tb >= 2,                 # >=2 grid steps (2 TCs / pipelining)
                tb % 16 == 0 or tb == batch,      # bf16 sublane packing
                tb)                               # then as large as possible
    return max(pool, key=score)


def encoder_forward(x_nchw, prepared, *, feature_dim=None):
    """x_nchw: (B, C, H, W) float32; prepared: prepare_encoder_weights(...)."""
    b, c, h, w = x_nchw.shape
    hs, ws = _conv_spatial(h, w)
    chans = (c,) + _CONV_CHANNELS
    taps, biases = prepared["taps"], prepared["biases"]
    fw, fb = prepared["fw"], prepared["fb"]
    compute_dtype = fw.dtype
    cdt_size = np.dtype(compute_dtype).itemsize
    fpad = fw.shape[1]

    chunks = tuple(_pick_width_chunks(ws[i], ws[i + 1], chans[i], _CONV_STRIDES[i])
                   for i in range(4))
    n_tap = 3 * sum(len(cks) for cks in chunks)
    assert len(taps) == n_tap, (len(taps), n_tap)
    assert fw.shape[0] == hs[4] * ws[4] * chans[4]

    # NCHW -> (H, B, W*C) in the compute dtype: one cheap transpose (the bf16
    # cast fuses into it and halves input HBM traffic / the input VMEM block).
    x = jnp.transpose(x_nchw, (2, 0, 3, 1)).reshape(h, b, w * c).astype(compute_dtype)

    weight_bytes = sum(int(np.prod(a.shape)) * np.dtype(a.dtype).itemsize
                       for a in (*taps, *biases, fw, fb))
    phys = _physical_vmem_bytes()
    budget = max(24 << 20, min(int(phys * 0.70), 96 << 20))
    need_fn = functools.partial(_vmem_need_bytes, hs=hs, ws=ws, chans=chans,
                                cdt_size=cdt_size, fpad=fpad,
                                weight_bytes=weight_bytes)
    tb = _pick_batch_tile(b, need_fn, budget)
    grid = (b // tb,)

    need = need_fn(tb)
    vmem_limit = int(min(max(need + (need >> 3) + (2 << 20), 16 << 20),
                         max(phys - (8 << 20), 32 << 20)))

    kernel = functools.partial(
        _encoder_kernel, tb=tb, hs=hs, ws=ws, chans=chans,
        strides=_CONV_STRIDES, chunks=chunks, compute_dtype=compute_dtype)

    m_max = hs[1] * tb
    k_max = max(ws[i] * chans[i] for i in range(4))
    n_max = max(ws[i + 1] * chans[i + 1] for i in range(4))
    scratch_shapes = [
        pltpu.VMEM((m_max, n_max), compute_dtype),                   # activations
        pltpu.VMEM((m_max, k_max), compute_dtype),                   # gathered LHS
        pltpu.VMEM((m_max, n_max), jnp.float32),                     # f32 accumulator
        pltpu.VMEM((tb, hs[4] * ws[4] * chans[4]), compute_dtype),   # FC slab
    ]

    operands = [x, *taps, *biases, fw, fb]
    in_specs = ([pl.BlockSpec((hs[0], tb, ws[0] * chans[0]), lambda i: (0, i, 0))]
                + [_full_spec(a) for a in operands[1:]])

    out = pl.pallas_call(
        kernel,
        out_shape=jax.ShapeDtypeStruct((b, fpad), jnp.float32),
        grid=grid,
        in_specs=in_specs,
        out_specs=pl.BlockSpec((tb, fpad), lambda i: (i, 0)),
        scratch_shapes=scratch_shapes,
        compiler_params=pltpu.CompilerParams(
            dimension_semantics=("parallel",),
            vmem_limit_bytes=vmem_limit),
    )(*operands)

    if feature_dim is None or feature_dim == fpad:
        return out
    return out[:, :feature_dim]


# ----------------------------------------------------------------------------
# One-time (init-time) weight preparation: per-chunk block-Toeplitz conv taps,
# tiled biases, FC weight permuted to match nn.Flatten() on NCHW and padded to
# a lane-dense feature dimension.
# ----------------------------------------------------------------------------
def prepare_encoder_weights(params, input_shape, compute_dtype=jnp.bfloat16):
    c, h, w = input_shape
    hs, ws = _conv_spatial(h, w)
    chans = (c,) + _CONV_CHANNELS

    taps, biases = [], []
    for li in range(4):
        wt = np.asarray(params[f"w{li + 1}"], np.float32)   # (Cout, Cin, 3, 3)
        bs = np.asarray(params[f"b{li + 1}"], np.float32)   # (Cout,)
        cout, cin = wt.shape[0], wt.shape[1]
        assert cin == chans[li] and cout == chans[li + 1]
        win, wout, s = ws[li], ws[li + 1], _CONV_STRIDES[li]
        full = np.zeros((3, win * cin, wout * cout), np.float32)
        for kh in range(3):
            for ow in range(wout):
                for kw in range(3):
                    iw = ow * s + kw - 1                    # width padding = 1
                    if 0 <= iw < win:
                        full[kh,
                             iw * cin:(iw + 1) * cin,
                             ow * cout:(ow + 1) * cout] = wt[:, :, kh, kw].T
        lchunks = _pick_width_chunks(win, wout, cin, s)
        for kh in range(3):                                 # order: (kh, chunk)
            for (col_lo, col_hi, ow_lo, ow_hi) in lchunks:
                taps.append(jnp.asarray(
                    full[kh,
                         col_lo * cin:col_hi * cin,
                         ow_lo * cout:ow_hi * cout], compute_dtype))
        biases.append(jnp.asarray(np.tile(bs, wout).reshape(1, wout * cout),
                                  jnp.float32))

    h4, w4, c4 = hs[4], ws[4], chans[4]
    f = int(params["w_fc"].shape[0])
    assert params["w_fc"].shape[1] == c4 * h4 * w4
    fpad = max(128, -(-f // 128) * 128)                     # lane-dense output
    wfc = np.asarray(params["w_fc"], np.float32).reshape(f, c4, h4, w4)
    wfc = np.transpose(wfc, (2, 3, 1, 0)).reshape(h4 * w4 * c4, f)  # slab layout
    wfc_p = np.zeros((h4 * w4 * c4, fpad), np.float32)
    wfc_p[:, :f] = wfc
    bfc_p = np.zeros((1, fpad), np.float32)
    bfc_p[0, :f] = np.asarray(params["b_fc"], np.float32)

    return {"taps": tuple(taps), "biases": tuple(biases),
            "fw": jnp.asarray(wfc_p, compute_dtype),
            "fb": jnp.asarray(bfc_p, jnp.float32)}


# ----------------------------------------------------------------------------
# Parameter init: orthogonal with gain sqrt(2), zero bias (as in the module).
# ----------------------------------------------------------------------------
def orthogonal_init(key, shape, gain):
    rows = shape[0]
    cols = int(np.prod(shape[1:]))
    n, m = max(rows, cols), min(rows, cols)
    a = jax.random.normal(key, (n, m), dtype=jnp.float32)
    q, r = jnp.linalg.qr(a)
    d = jnp.diagonal(r)
    q = q * jnp.where(d >= 0.0, 1.0, -1.0)
    if rows < cols:
        q = q.T
    return (gain * q[:rows, :cols]).reshape(shape).astype(jnp.float32)


def make_params(key, input_shape, feature_dim):
    c, h, w = input_shape
    fc_size = (h // 8) * (w // 8)
    gain = 2.0 ** 0.5
    keys = jax.random.split(key, 5)
    return {
        "w1": orthogonal_init(keys[0], (16, c, 3, 3), gain),
        "b1": jnp.zeros((16,), jnp.float32),
        "w2": orthogonal_init(keys[1], (32, 16, 3, 3), gain),
        "b2": jnp.zeros((32,), jnp.float32),
        "w3": orthogonal_init(keys[2], (64, 32, 3, 3), gain),
        "b3": jnp.zeros((64,), jnp.float32),
        "w4": orthogonal_init(keys[3], (64, 64, 3, 3), gain),
        "b4": jnp.zeros((64,), jnp.float32),
        "w_fc": orthogonal_init(keys[4], (feature_dim, 64 * fc_size), gain),
        "b_fc": jnp.zeros((feature_dim,), jnp.float32),
    }


# ----------------------------------------------------------------------------
# Pure-JAX reference (lax.conv, full f32 precision) for the correctness check.
# ----------------------------------------------------------------------------
def encoder_forward_ref(x_nchw, params):
    hi = jax.lax.Precision.HIGHEST

    def conv(x, wt, bs, stride):
        y = jax.lax.conv_general_dilated(
            x, wt, window_strides=(stride, stride), padding=((1, 1), (1, 1)),
            dimension_numbers=("NCHW", "OIHW", "NCHW"), precision=hi)
        y = y + bs.reshape(1, -1, 1, 1)
        return jnp.where(y > 0.0, y, jnp.exp(jnp.minimum(y, 0.0)) - 1.0)

    x = conv(x_nchw, params["w1"], params["b1"], 2)
    x = conv(x, params["w2"], params["b2"], 2)
    x = conv(x, params["w3"], params["b3"], 2)
    x = conv(x, params["w4"], params["b4"], 1)
    x = x.reshape(x.shape[0], -1)                      # NCHW flatten
    return jnp.dot(x, params["w_fc"].T, precision=hi) + params["b_fc"]


if __name__ == "__main__":
    # Small shapes consistent with the module: input_shape=(4,16,16), fdim=32.
    input_shape = (4, 16, 16)
    feature_dim = 32
    batch = 2

    key = jax.random.PRNGKey(0)
    k_param, k_x = jax.random.split(key)
    params = make_params(k_param, input_shape, feature_dim)
    x = jax.random.normal(k_x, (batch,) + input_shape, dtype=jnp.float32)

    ref = np.asarray(jax.block_until_ready(encoder_forward_ref(x, params)))
    fwd = jax.jit(functools.partial(encoder_forward, feature_dim=feature_dim))

    # Structural correctness check: f32 operands end-to-end.
    prep_f32 = prepare_encoder_weights(params, input_shape, jnp.float32)
    out_f32 = np.asarray(jax.block_until_ready(fwd(x, prep_f32)))
    assert out_f32.shape == (batch, feature_dim), out_f32.shape
    np.testing.assert_allclose(out_f32, ref, rtol=1e-2, atol=2e-2)

    # Performance path: bf16 MXU operands, f32 accumulation / bias / ELU.
    # (bf16 weights + activations across 4 layers => loose tolerance, expected.)
    prep_bf16 = prepare_encoder_weights(params, input_shape, jnp.bfloat16)
    out_bf16 = np.asarray(jax.block_until_ready(fwd(x, prep_bf16)))
    assert out_bf16.shape == (batch, feature_dim), out_bf16.shape
    np.testing.assert_allclose(out_bf16, ref, rtol=1e-1, atol=1e-1)

    print("KERNEL_OK")
</pallas_src>

<mosaic_0001>
module attributes {stable_mosaic.version = 11 : i64} {
  func.func @_encoder_kernel(%arg0: i32, %arg1: memref<16x2x64xf32, #tpu.memory_space<vmem>>, %arg2: memref<64x128xf32, #tpu.memory_space<vmem>>, %arg3: memref<64x128xf32, #tpu.memory_space<vmem>>, %arg4: memref<64x128xf32, #tpu.memory_space<vmem>>, %arg5: memref<128x128xf32, #tpu.memory_space<vmem>>, %arg6: memref<128x128xf32, #tpu.memory_space<vmem>>, %arg7: memref<128x128xf32, #tpu.memory_space<vmem>>, %arg8: memref<128x128xf32, #tpu.memory_space<vmem>>, %arg9: memref<128x128xf32, #tpu.memory_space<vmem>>, %arg10: memref<128x128xf32, #tpu.memory_space<vmem>>, %arg11: memref<128x128xf32, #tpu.memory_space<vmem>>, %arg12: memref<128x128xf32, #tpu.memory_space<vmem>>, %arg13: memref<128x128xf32, #tpu.memory_space<vmem>>, %arg14: memref<1x128xf32, #tpu.memory_space<vmem>>, %arg15: memref<1x128xf32, #tpu.memory_space<vmem>>, %arg16: memref<1x128xf32, #tpu.memory_space<vmem>>, %arg17: memref<1x128xf32, #tpu.memory_space<vmem>>, %arg18: memref<256x128xf32, #tpu.memory_space<vmem>>, %arg19: memref<1x128xf32, #tpu.memory_space<vmem>>, %arg20: memref<2x128xf32, #tpu.memory_space<vmem>>, %arg21: memref<16x128xf32, #tpu.memory_space<vmem>>, %arg22: memref<16x128xf32, #tpu.memory_space<vmem>>, %arg23: memref<16x128xf32, #tpu.memory_space<vmem>>, %arg24: memref<2x256xf32, #tpu.memory_space<vmem>>) attributes {dimension_semantics = [#tpu.dimension_semantics<parallel>], iteration_bounds = array<i64: 1>, scalar_prefetch = 0 : i64, scratch_operands = 4 : i64, tpu.core_type = #tpu.core_type<tc>, window_params = [{transform_indices = @transform_0, window_bounds = array<i64: 16, 2, 64>}, {pipeline_mode = #tpu.pipeline_mode<synchronous>, transform_indices = @transform_1, window_bounds = array<i64: 64, 128>}, {pipeline_mode = #tpu.pipeline_mode<synchronous>, transform_indices = @transform_2, window_bounds = array<i64: 64, 128>}, {pipeline_mode = #tpu.pipeline_mode<synchronous>, transform_indices = @transform_3, window_bounds = array<i64: 64, 128>}, {pipeline_mode = #tpu.pipeline_mode<synchronous>, transform_indices = @transform_4, window_bounds = array<i64: 128, 128>}, {pipeline_mode = #tpu.pipeline_mode<synchronous>, transform_indices = @transform_5, window_bounds = array<i64: 128, 128>}, {pipeline_mode = #tpu.pipeline_mode<synchronous>, transform_indices = @transform_6, window_bounds = array<i64: 128, 128>}, {pipeline_mode = #tpu.pipeline_mode<synchronous>, transform_indices = @transform_7, window_bounds = array<i64: 128, 128>}, {pipeline_mode = #tpu.pipeline_mode<synchronous>, transform_indices = @transform_8, window_bounds = array<i64: 128, 128>}, {pipeline_mode = #tpu.pipeline_mode<synchronous>, transform_indices = @transform_9, window_bounds = array<i64: 128, 128>}, {pipeline_mode = #tpu.pipeline_mode<synchronous>, transform_indices = @transform_10, window_bounds = array<i64: 128, 128>}, {pipeline_mode = #tpu.pipeline_mode<synchronous>, transform_indices = @transform_11, window_bounds = array<i64: 128, 128>}, {pipeline_mode = #tpu.pipeline_mode<synchronous>, transform_indices = @transform_12, window_bounds = array<i64: 128, 128>}, {pipeline_mode = #tpu.pipeline_mode<synchronous>, transform_indices = @transform_13, window_bounds = array<i64: 1, 128>}, {pipeline_mode = #tpu.pipeline_mode<synchronous>, transform_indices = @transform_14, window_bounds = array<i64: 1, 128>}, {pipeline_mode = #tpu.pipeline_mode<synchronous>, transform_indices = @transform_15, window_bounds = array<i64: 1, 128>}, {pipeline_mode = #tpu.pipeline_mode<synchronous>, transform_indices = @transform_16, window_bounds = array<i64: 1, 128>}, {pipeline_mode = #tpu.pipeline_mode<synchronous>, transform_indices = @transform_17, window_bounds = array<i64: 256, 128>}, {pipeline_mode = #tpu.pipeline_mode<synchronous>, transform_indices = @transform_18, window_bounds = array<i64: 1, 128>}, {transform_indices = @transform_19, window_bounds = array<i64: 2, 128>}]} {
    %cst = arith.constant 0.000000e+00 : f32
    %0 = vector.broadcast %cst : f32 to vector<2x64xf32>
    %c0 = arith.constant 0 : index
    %c0_0 = arith.constant 0 : index
    %1 = vector.load %arg22[%c0, %c0_0] : memref<16x128xf32, #tpu.memory_space<vmem>>, vector<2x64xf32>
    tpu.vector_store %arg22[%c0, %c0_0], %0 {strides = array<i32>} : memref<16x128xf32, #tpu.memory_space<vmem>>, vector<2x64xf32>,
    %c1 = arith.constant 1 : index
    %c0_1 = arith.constant 0 : index
    %c0_2 = arith.constant 0 : index
    %2 = vector.load %arg1[%c1, %c0_1, %c0_2] : memref<16x2x64xf32, #tpu.memory_space<vmem>>, vector<1x2x64xf32>
    %3 = vector.shape_cast %2 : vector<1x2x64xf32> to vector<2x64xf32>
    %c2 = arith.constant 2 : index
    %c0_3 = arith.constant 0 : index
    %4 = vector.load %arg22[%c2, %c0_3] : memref<16x128xf32, #tpu.memory_space<vmem>>, vector<2x64xf32>
    tpu.vector_store %arg22[%c2, %c0_3], %3 {strides = array<i32>} : memref<16x128xf32, #tpu.memory_space<vmem>>, vector<2x64xf32>,
    %c3 = arith.constant 3 : index
    %c0_4 = arith.constant 0 : index
    %c0_5 = arith.constant 0 : index
    %5 = vector.load %arg1[%c3, %c0_4, %c0_5] : memref<16x2x64xf32, #tpu.memory_space<vmem>>, vector<1x2x64xf32>
    %6 = vector.shape_cast %5 : vector<1x2x64xf32> to vector<2x64xf32>
    %c4 = arith.constant 4 : index
    %c0_6 = arith.constant 0 : index
    %7 = vector.load %arg22[%c4, %c0_6] : memref<16x128xf32, #tpu.memory_space<vmem>>, vector<2x64xf32>
    tpu.vector_store %arg22[%c4, %c0_6], %6 {strides = array<i32>} : memref<16x128xf32, #tpu.memory_space<vmem>>, vector<2x64xf32>,
    %c5 = arith.constant 5 : index
    %c0_7 = arith.constant 0 : index
    %c0_8 = arith.constant 0 : index
    %8 = vector.load %arg1[%c5, %c0_7, %c0_8] : memref<16x2x64xf32, #tpu.memory_space<vmem>>, vector<1x2x64xf32>
    %9 = vector.shape_cast %8 : vector<1x2x64xf32> to vector<2x64xf32>
    %c6 = arith.constant 6 : index
    %c0_9 = arith.constant 0 : index
    %10 = vector.load %arg22[%c6, %c0_9] : memref<16x128xf32, #tpu.memory_space<vmem>>, vector<2x64xf32>
    tpu.vector_store %arg22[%c6, %c0_9], %9 {strides = array<i32>} : memref<16x128xf32, #tpu.memory_space<vmem>>, vector<2x64xf32>,
    %c7 = arith.constant 7 : index
    %c0_10 = arith.constant 0 : index
    %c0_11 = arith.constant 0 : index
    %11 = vector.load %arg1[%c7, %c0_10, %c0_11] : memref<16x2x64xf32, #tpu.memory_space<vmem>>, vector<1x2x64xf32>
    %12 = vector.shape_cast %11 : vector<1x2x64xf32> to vector<2x64xf32>
    %c8 = arith.constant 8 : index
    %c0_12 = arith.constant 0 : index
    %13 = vector.load %arg22[%c8, %c0_12] : memref<16x128xf32, #tpu.memory_space<vmem>>, vector<2x64xf32>
    tpu.vector_store %arg22[%c8, %c0_12], %12 {strides = array<i32>} : memref<16x128xf32, #tpu.memory_space<vmem>>, vector<2x64xf32>,
    %c9 = arith.constant 9 : index
    %c0_13 = arith.constant 0 : index
    %c0_14 = arith.constant 0 : index
    %14 = vector.load %arg1[%c9, %c0_13, %c0_14] : memref<16x2x64xf32, #tpu.memory_space<vmem>>, vector<1x2x64xf32>
    %15 = vector.shape_cast %14 : vector<1x2x64xf32> to vector<2x64xf32>
    %c10 = arith.constant 10 : index
    %c0_15 = arith.constant 0 : index
    %16 = vector.load %arg22[%c10, %c0_15] : memref<16x128xf32, #tpu.memory_space<vmem>>, vector<2x64xf32>
    tpu.vector_store %arg22[%c10, %c0_15], %15 {strides = array<i32>} : memref<16x128xf32, #tpu.memory_space<vmem>>, vector<2x64xf32>,
    %c11 = arith.constant 11 : index
    %c0_16 = arith.constant 0 : index
    %c0_17 = arith.constant 0 : index
    %17 = vector.load %arg1[%c11, %c0_16, %c0_17] : memref<16x2x64xf32, #tpu.memory_space<vmem>>, vector<1x2x64xf32>
    %18 = vector.shape_cast %17 : vector<1x2x64xf32> to vector<2x64xf32>
    %c12 = arith.constant 12 : index
    %c0_18 = arith.constant 0 : index
    %19 = vector.load %arg22[%c12, %c0_18] : memref<16x128xf32, #tpu.memory_space<vmem>>, vector<2x64xf32>
    tpu.vector_store %arg22[%c12, %c0_18], %18 {strides = array<i32>} : memref<16x128xf32, #tpu.memory_space<vmem>>, vector<2x64xf32>,
    %c13 = arith.constant 13 : index
    %c0_19 = arith.constant 0 : index
    %c0_20 = arith.constant 0 : index
    %20 = vector.load %arg1[%c13, %c0_19, %c0_20] : memref<16x2x64xf32, #tpu.memory_space<vmem>>, vector<1x2x64xf32>
    %21 = vector.shape_cast %20 : vector<1x2x64xf32> to vector<2x64xf32>
    %c14 = arith.constant 14 : index
    %c0_21 = arith.constant 0 : index
    %22 = vector.load %arg22[%c14, %c0_21] : memref<16x128xf32, #tpu.memory_space<vmem>>, vector<2x64xf32>
    tpu.vector_store %arg22[%c14, %c0_21], %21 {strides = array<i32>} : memref<16x128xf32, #tpu.memory_space<vmem>>, vector<2x64xf32>,
    %c0_22 = arith.constant 0 : index
    %c0_23 = arith.constant 0 : index
    %23 = vector.load %arg22[%c0_22, %c0_23] : memref<16x128xf32, #tpu.memory_space<vmem>>, vector<16x64xf32>
    %c0_24 = arith.constant 0 : index
    %c0_25 = arith.constant 0 : index
    %24 = vector.load %arg2[%c0_24, %c0_25] : memref<64x128xf32, #tpu.memory_space<vmem>>, vector<64x128xf32>
    %cst_26 = arith.constant dense<0.000000e+00> : vector<16x128xf32>
    %25 = tpu.matmul %23, %24, %cst_26 {dimension_numbers = #tpu.dot_dimension_numbers<[1], [0], [0], [1], [0, 0, 1, 1], [], []>} : vector<16x64xf32>, vector<64x128xf32>, vector<16x128xf32> -> vector<16x128xf32>
    %c0_27 = arith.constant 0 : index
    %c0_28 = arith.constant 0 : index
    %26 = vector.load %arg23[%c0_27, %c0_28] : memref<16x128xf32, #tpu.memory_space<vmem>>, vector<16x128xf32>
    tpu.vector_store %arg23[%c0_27, %c0_28], %25 {strides = array<i32>} : memref<16x128xf32, #tpu.memory_space<vmem>>, vector<16x128xf32>,
    %c0_29 = arith.constant 0 : index
    %c0_30 = arith.constant 0 : index
    %c0_31 = arith.constant 0 : index
    %27 = vector.load %arg1[%c0_29, %c0_30, %c0_31] : memref<16x2x64xf32, #tpu.memory_space<vmem>>, vector<1x2x64xf32>
    %28 = vector.shape_cast %27 : vector<1x2x64xf32> to vector<2x64xf32>
    %c0_32 = arith.constant 0 : index
    %c0_33 = arith.constant 0 : index
    %29 = vector.load %arg22[%c0_32, %c0_33] : memref<16x128xf32, #tpu.memory_space<vmem>>, vector<2x64xf32>
    tpu.vector_store %arg22[%c0_32, %c0_33], %28 {strides = array<i32>} : memref<16x128xf32, #tpu.memory_space<vmem>>, vector<2x64xf32>,
    %c2_34 = arith.constant 2 : index
    %c0_35 = arith.constant 0 : index
    %c0_36 = arith.constant 0 : index
    %30 = vector.load %arg1[%c2_34, %c0_35, %c0_36] : memref<16x2x64xf32, #tpu.memory_space<vmem>>, vector<1x2x64xf32>
    %31 = vector.shape_cast %30 : vector<1x2x64xf32> to vector<2x64xf32>
    %c2_37 = arith.constant 2 : index
    %c0_38 = arith.constant 0 : index
    %32 = vector.load %arg22[%c2_37, %c0_38] : memref<16x128xf32, #tpu.memory_space<vmem>>, vector<2x64xf32>
    tpu.vector_store %arg22[%c2_37, %c0_38], %31 {strides = array<i32>} : memref<16x128xf32, #tpu.memory_space<vmem>>, vector<2x64xf32>,
    %c4_39 = arith.constant 4 : index
    %c0_40 = arith.constant 0 : index
    %c0_41 = arith.constant 0 : index
    %33 = vector.load %arg1[%c4_39, %c0_40, %c0_41] : memref<16x2x64xf32, #tpu.memory_space<vmem>>, vector<1x2x64xf32>
    %34 = vector.shape_cast %33 : vector<1x2x64xf32> to vector<2x64xf32>
    %c4_42 = arith.constant 4 : index
    %c0_43 = arith.constant 0 : index
    %35 = vector.load %arg22[%c4_42, %c0_43] : memref<16x128xf32, #tpu.memory_space<vmem>>, vector<2x64xf32>
    tpu.vector_store %arg22[%c4_42, %c0_43], %34 {strides = array<i32>} : memref<16x128xf32, #tpu.memory_space<vmem>>, vector<2x64xf32>,
    %c6_44 = arith.constant 6 : index
    %c0_45 = arith.constant 0 : index
    %c0_46 = arith.constant 0 : index
    %36 = vector.load %arg1[%c6_44, %c0_45, %c0_46] : memref<16x2x64xf32, #tpu.memory_space<vmem>>, vector<1x2x64xf32>
    %37 = vector.shape_cast %36 : vector<1x2x64xf32> to vector<2x64xf32>
    %c6_47 = arith.constant 6 : index
    %c0_48 = arith.constant 0 : index
    %38 = vector.load %arg22[%c6_47, %c0_48] : memref<16x128xf32, #tpu.memory_space<vmem>>, vector<2x64xf32>
    tpu.vector_store %arg22[%c6_47, %c0_48], %37 {strides = array<i32>} : memref<16x128xf32, #tpu.memory_space<vmem>>, vector<2x64xf32>,
    %c8_49 = arith.constant 8 : index
    %c0_50 = arith.constant 0 : index
    %c0_51 = arith.constant 0 : index
    %39 = vector.load %arg1[%c8_49, %c0_50, %c0_51] : memref<16x2x64xf32, #tpu.memory_space<vmem>>, vector<1x2x64xf32>
    %40 = vector.shape_cast %39 : vector<1x2x64xf32> to vector<2x64xf32>
    %c8_52 = arith.constant 8 : index
    %c0_53 = arith.constant 0 : index
    %41 = vector.load %arg22[%c8_52, %c0_53] : memref<16x128xf32, #tpu.memory_space<vmem>>, vector<2x64xf32>
    tpu.vector_store %arg22[%c8_52, %c0_53], %40 {strides = array<i32>} : memref<16x128xf32, #tpu.memory_space<vmem>>, vector<2x64xf32>,
    %c10_54 = arith.constant 10 : index
    %c0_55 = arith.constant 0 : index
    %c0_56 = arith.constant 0 : index
    %42 = vector.load %arg1[%c10_54, %c0_55, %c0_56] : memref<16x2x64xf32, #tpu.memory_space<vmem>>, vector<1x2x64xf32>
    %43 = vector.shape_cast %42 : vector<1x2x64xf32> to vector<2x64xf32>
    %c10_57 = arith.constant 10 : index
    %c0_58 = arith.constant 0 : index
    %44 = vector.load %arg22[%c10_57, %c0_58] : memref<16x128xf32, #tpu.memory_space<vmem>>, vector<2x64xf32>
    tpu.vector_store %arg22[%c10_57, %c0_58], %43 {strides = array<i32>} : memref<16x128xf32, #tpu.memory_space<vmem>>, vector<2x64xf32>,
    %c12_59 = arith.constant 12 : index
    %c0_60 = arith.constant 0 : index
    %c0_61 = arith.constant 0 : index
    %45 = vector.load %arg1[%c12_59, %c0_60, %c0_61] : memref<16x2x64xf32, #tpu.memory_space<vmem>>, vector<1x2x64xf32>
    %46 = vector.shape_cast %45 : vector<1x2x64xf32> to vector<2x64xf32>
    %c12_62 = arith.constant 12 : index
    %c0_63 = arith.constant 0 : index
    %47 = vector.load %arg22[%c12_62, %c0_63] : memref<16x128xf32, #tpu.memory_space<vmem>>, vector<2x64xf32>
    tpu.vector_store %arg22[%c12_62, %c0_63], %46 {strides = array<i32>} : memref<16x128xf32, #tpu.memory_space<vmem>>, vector<2x64xf32>,
    %c14_64 = arith.constant 14 : index
    %c0_65 = arith.constant 0 : index
    %c0_66 = arith.constant 0 : index
    %48 = vector.load %arg1[%c14_64, %c0_65, %c0_66] : memref<16x2x64xf32, #tpu.memory_space<vmem>>, vector<1x2x64xf32>
    %49 = vector.shape_cast %48 : vector<1x2x64xf32> to vector<2x64xf32>
    %c14_67 = arith.constant 14 : index
    %c0_68 = arith.constant 0 : index
    %50 = vector.load %arg22[%c14_67, %c0_68] : memref<16x128xf32, #tpu.memory_space<vmem>>, vector<2x64xf32>
    tpu.vector_store %arg22[%c14_67, %c0_68], %49 {strides = array<i32>} : memref<16x128xf32, #tpu.memory_space<vmem>>, vector<2x64xf32>,
    %c0_69 = arith.constant 0 : index
    %c0_70 = arith.constant 0 : index
    %51 = vector.load %arg22[%c0_69, %c0_70] : memref<16x128xf32, #tpu.memory_space<vmem>>, vector<16x64xf32>
    %c0_71 = arith.constant 0 : index
    %c0_72 = arith.constant 0 : index
    %52 = vector.load %arg3[%c0_71, %c0_72] : memref<64x128xf32, #tpu.memory_space<vmem>>, vector<64x128xf32>
    %cst_73 = arith.constant dense<0.000000e+00> : vector<16x128xf32>
    %53 = tpu.matmul %51, %52, %cst_73 {dimension_numbers = #tpu.dot_dimension_numbers<[1], [0], [0], [1], [0, 0, 1, 1], [], []>} : vector<16x64xf32>, vector<64x128xf32>, vector<16x128xf32> -> vector<16x128xf32>
    %c0_74 = arith.constant 0 : index
    %c0_75 = arith.constant 0 : index
    %54 = vector.load %arg23[%c0_74, %c0_75] : memref<16x128xf32, #tpu.memory_space<vmem>>, vector<16x128xf32>
    %55 = arith.addf %54, %53 : vector<16x128xf32>
    %c0_76 = arith.constant 0 : index
    %c0_77 = arith.constant 0 : index
    %56 = vector.load %arg23[%c0_76, %c0_77] : memref<16x128xf32, #tpu.memory_space<vmem>>, vector<16x128xf32>
    tpu.vector_store %arg23[%c0_76, %c0_77], %55 {strides = array<i32>} : memref<16x128xf32, #tpu.memory_space<vmem>>, vector<16x128xf32>,
    %c1_78 = arith.constant 1 : index
    %c0_79 = arith.constant 0 : index
    %c0_80 = arith.constant 0 : index
    %57 = vector.load %arg1[%c1_78, %c0_79, %c0_80] : memref<16x2x64xf32, #tpu.memory_space<vmem>>, vector<1x2x64xf32>
    %58 = vector.shape_cast %57 : vector<1x2x64xf32> to vector<2x64xf32>
    %c0_81 = arith.constant 0 : index
    %c0_82 = arith.constant 0 : index
    %59 = vector.load %arg22[%c0_81, %c0_82] : memref<16x128xf32, #tpu.memory_space<vmem>>, vector<2x64xf32>
    tpu.vector_store %arg22[%c0_81, %c0_82], %58 {strides = array<i32>} : memref<16x128xf32, #tpu.memory_space<vmem>>, vector<2x64xf32>,
    %c3_83 = arith.constant 3 : index
    %c0_84 = arith.constant 0 : index
    %c0_85 = arith.constant 0 : index
    %60 = vector.load %arg1[%c3_83, %c0_84, %c0_85] : memref<16x2x64xf32, #tpu.memory_space<vmem>>, vector<1x2x64xf32>
    %61 = vector.shape_cast %60 : vector<1x2x64xf32> to vector<2x64xf32>
    %c2_86 = arith.constant 2 : index
    %c0_87 = arith.constant 0 : index
    %62 = vector.load %arg22[%c2_86, %c0_87] : memref<16x128xf32, #tpu.memory_space<vmem>>, vector<2x64xf32>
    tpu.vector_store %arg22[%c2_86, %c0_87], %61 {strides = array<i32>} : memref<16x128xf32, #tpu.memory_space<vmem>>, vector<2x64xf32>,
    %c5_88 = arith.constant 5 : index
    %c0_89 = arith.constant 0 : index
    %c0_90 = arith.constant 0 : index
    %63 = vector.load %arg1[%c5_88, %c0_89, %c0_90] : memref<16x2x64xf32, #tpu.memory_space<vmem>>, vector<1x2x64xf32>
    %64 = vector.shape_cast %63 : vector<1x2x64xf32> to vector<2x64xf32>
    %c4_91 = arith.constant 4 : index
    %c0_92 = arith.constant 0 : index
    %65 = vector.load %arg22[%c4_91, %c0_92] : memref<16x128xf32, #tpu.memory_space<vmem>>, vector<2x64xf32>
    tpu.vector_store %arg22[%c4_91, %c0_92], %64 {strides = array<i32>} : memref<16x128xf32, #tpu.memory_space<vmem>>, vector<2x64xf32>,
    %c7_93 = arith.constant 7 : index
    %c0_94 = arith.constant 0 : index
    %c0_95 = arith.constant 0 : index
    %66 = vector.load %arg1[%c7_93, %c0_94, %c0_95] : memref<16x2x64xf32, #tpu.memory_space<vmem>>, vector<1x2x64xf32>
    %67 = vector.shape_cast %66 : vector<1x2x64xf32> to vector<2x64xf32>
    %c6_96 = arith.constant 6 : index
    %c0_97 = arith.constant 0 : index
    %68 = vector.load %arg22[%c6_96, %c0_97] : memref<16x128xf32, #tpu.memory_space<vmem>>, vector<2x64xf32>
    tpu.vector_store %arg22[%c6_96, %c0_97], %67 {strides = array<i32>} : memref<16x128xf32, #tpu.memory_space<vmem>>, vector<2x64xf32>,
    %c9_98 = arith.constant 9 : index
    %c0_99 = arith.constant 0 : index
    %c0_100 = arith.constant 0 : index
    %69 = vector.load %arg1[%c9_98, %c0_99, %c0_100] : memref<16x2x64xf32, #tpu.memory_space<vmem>>, vector<1x2x64xf32>
    %70 = vector.shape_cast %69 : vector<1x2x64xf32> to vector<2x64xf32>
    %c8_101 = arith.constant 8 : index
    %c0_102 = arith.constant 0 : index
    %71 = vector.load %arg22[%c8_101, %c0_102] : memref<16x128xf32, #tpu.memory_space<vmem>>, vector<2x64xf32>
    tpu.vector_store %arg22[%c8_101, %c0_102], %70 {strides = array<i32>} : memref<16x128xf32, #tpu.memory_space<vmem>>, vector<2x64xf32>,
    %c11_103 = arith.constant 11 : index
    %c0_104 = arith.constant 0 : index
    %c0_105 = arith.constant 0 : index
    %72 = vector.load %arg1[%c11_103, %c0_104, %c0_105] : memref<16x2x64xf32, #tpu.memory_space<vmem>>, vector<1x2x64xf32>
    %73 = vector.shape_cast %72 : vector<1x2x64xf32> to vector<2x64xf32>
    %c10_106 = arith.constant 10 : index
    %c0_107 = arith.constant 0 : index
    %74 = vector.load %arg22[%c10_106, %c0_107] : memref<16x128xf32, #tpu.memory_space<vmem>>, vector<2x64xf32>
    tpu.vector_store %arg22[%c10_106, %c0_107], %73 {strides = array<i32>} : memref<16x128xf32, #tpu.memory_space<vmem>>, vector<2x64xf32>,
    %c13_108 = arith.constant 13 : index
    %c0_109 = arith.constant 0 : index
    %c0_110 = arith.constant 0 : index
    %75 = vector.load %arg1[%c13_108, %c0_109, %c0_110] : memref<16x2x64xf32, #tpu.memory_space<vmem>>, vector<1x2x64xf32>
    %76 = vector.shape_cast %75 : vector<1x2x64xf32> to vector<2x64xf32>
    %c12_111 = arith.constant 12 : index
    %c0_112 = arith.constant 0 : index
    %77 = vector.load %arg22[%c12_111, %c0_112] : memref<16x128xf32, #tpu.memory_space<vmem>>, vector<2x64xf32>
    tpu.vector_store %arg22[%c12_111, %c0_112], %76 {strides = array<i32>} : memref<16x128xf32, #tpu.memory_space<vmem>>, vector<2x64xf32>,
    %c15 = arith.constant 15 : index
    %c0_113 = arith.constant 0 : index
    %c0_114 = arith.constant 0 : index
    %78 = vector.load %arg1[%c15, %c0_113, %c0_114] : memref<16x2x64xf32, #tpu.memory_space<vmem>>, vector<1x2x64xf32>
    %79 = vector.shape_cast %78 : vector<1x2x64xf32> to vector<2x64xf32>
    %c14_115 = arith.constant 14 : index
    %c0_116 = arith.constant 0 : index
    %80 = vector.load %arg22[%c14_115, %c0_116] : memref<16x128xf32, #tpu.memory_space<vmem>>, vector<2x64xf32>
    tpu.vector_store %arg22[%c14_115, %c0_116], %79 {strides = array<i32>} : memref<16x128xf32, #tpu.memory_space<vmem>>, vector<2x64xf32>,
    %c0_117 = arith.constant 0 : index
    %c0_118 = arith.constant 0 : index
    %81 = vector.load %arg22[%c0_117, %c0_118] : memref<16x128xf32, #tpu.memory_space<vmem>>, vector<16x64xf32>
    %c0_119 = arith.constant 0 : index
    %c0_120 = arith.constant 0 : index
    %82 = vector.load %arg4[%c0_119, %c0_120] : memref<64x128xf32, #tpu.memory_space<vmem>>, vector<64x128xf32>
    %cst_121 = arith.constant dense<0.000000e+00> : vector<16x128xf32>
    %83 = tpu.matmul %81, %82, %cst_121 {dimension_numbers = #tpu.dot_dimension_numbers<[1], [0], [0], [1], [0, 0, 1, 1], [], []>} : vector<16x64xf32>, vector<64x128xf32>, vector<16x128xf32> -> vector<16x128xf32>
    %c0_122 = arith.constant 0 : index
    %c0_123 = arith.constant 0 : index
    %84 = vector.load %arg23[%c0_122, %c0_123] : memref<16x128xf32, #tpu.memory_space<vmem>>, vector<16x128xf32>
    %85 = arith.addf %84, %83 : vector<16x128xf32>
    %c0_124 = arith.constant 0 : index
    %c0_125 = arith.constant 0 : index
    %86 = vector.load %arg23[%c0_124, %c0_125] : memref<16x128xf32, #tpu.memory_space<vmem>>, vector<16x128xf32>
    tpu.vector_store %arg23[%c0_124, %c0_125], %85 {strides = array<i32>} : memref<16x128xf32, #tpu.memory_space<vmem>>, vector<16x128xf32>,
    %c0_126 = arith.constant 0 : index
    %c0_127 = arith.constant 0 : index
    %87 = vector.load %arg23[%c0_126, %c0_127] : memref<16x128xf32, #tpu.memory_space<vmem>>, vector<16x128xf32>
    %c0_128 = arith.constant 0 : index
    %c0_129 = arith.constant 0 : index
    %88 = vector.load %arg14[%c0_128, %c0_129] : memref<1x128xf32, #tpu.memory_space<vmem>>, vector<1x128xf32>
    %89 = vector.broadcast %88 : vector<1x128xf32> to vector<16x128xf32>
    %90 = arith.addf %87, %89 : vector<16x128xf32>
    %cst_130 = arith.constant 0.000000e+00 : f32
    %91 = vector.broadcast %cst_130 : f32 to vector<16x128xf32>
    %92 = arith.cmpf ogt, %90, %91 : vector<16x128xf32>
    %cst_131 = arith.constant 0.000000e+00 : f32
    %93 = vector.broadcast %cst_131 : f32 to vector<16x128xf32>
    %94 = arith.minimumf %90, %93 : vector<16x128xf32>
    %95 = math.exp %94 : vector<16x128xf32>
    %cst_132 = arith.constant 1.000000e+00 : f32
    %96 = vector.broadcast %cst_132 : f32 to vector<16x128xf32>
    %97 = arith.subf %95, %96 : vector<16x128xf32>
    %98 = arith.select %92, %90, %97 : vector<16x128xi1>, vector<16x128xf32>
    %c0_133 = arith.constant 0 : index
    %c0_134 = arith.constant 0 : index
    %99 = vector.load %arg21[%c0_133, %c0_134] : memref<16x128xf32, #tpu.memory_space<vmem>>, vector<16x128xf32>
    tpu.vector_store %arg21[%c0_133, %c0_134], %98 {strides = array<i32>} : memref<16x128xf32, #tpu.memory_space<vmem>>, vector<16x128xf32>,
    %cst_135 = arith.constant 0.000000e+00 : f32
    %100 = vector.broadcast %cst_135 : f32 to vector<2x128xf32>
    %c0_136 = arith.constant 0 : index
    %c0_137 = arith.constant 0 : index
    %101 = vector.load %arg22[%c0_136, %c0_137] : memref<16x128xf32, #tpu.memory_space<vmem>>, vector<2x128xf32>
    tpu.vector_store %arg22[%c0_136, %c0_137], %100 {strides = array<i32>} : memref<16x128xf32, #tpu.memory_space<vmem>>, vector<2x128xf32>,
    %c2_138 = arith.constant 2 : index
    %c0_139 = arith.constant 0 : index
    %102 = vector.load %arg21[%c2_138, %c0_139] : memref<16x128xf32, #tpu.memory_space<vmem>>, vector<2x128xf32>
    %c2_140 = arith.constant 2 : index
    %c0_141 = arith.constant 0 : index
    %103 = vector.load %arg22[%c2_140, %c0_141] : memref<16x128xf32, #tpu.memory_space<vmem>>, vector<2x128xf32>
    tpu.vector_store %arg22[%c2_140, %c0_141], %102 {strides = array<i32>} : memref<16x128xf32, #tpu.memory_space<vmem>>, vector<2x128xf32>,
    %c6_142 = arith.constant 6 : index
    %c0_143 = arith.constant 0 : index
    %104 = vector.load %arg21[%c6_142, %c0_143] : memref<16x128xf32, #tpu.memory_space<vmem>>, vector<2x128xf32>
    %c4_144 = arith.constant 4 : index
    %c0_145 = arith.constant 0 : index
    %105 = vector.load %arg22[%c4_144, %c0_145] : memref<16x128xf32, #tpu.memory_space<vmem>>, vector<2x128xf32>
    tpu.vector_store %arg22[%c4_144, %c0_145], %104 {strides = array<i32>} : memref<16x128xf32, #tpu.memory_space<vmem>>, vector<2x128xf32>,
    %c10_146 = arith.constant 10 : index
    %c0_147 = arith.constant 0 : index
    %106 = vector.load %arg21[%c10_146, %c0_147] : memref<16x128xf32, #tpu.memory_space<vmem>>, vector<2x128xf32>
    %c6_148 = arith.constant 6 : index
    %c0_149 = arith.constant 0 : index
    %107 = vector.load %arg22[%c6_148, %c0_149] : memref<16x128xf32, #tpu.memory_space<vmem>>, vector<2x128xf32>
    tpu.vector_store %arg22[%c6_148, %c0_149], %106 {strides = array<i32>} : memref<16x128xf32, #tpu.memory_space<vmem>>, vector<2x128xf32>,
    %c0_150 = arith.constant 0 : index
    %c0_151 = arith.constant 0 : index
    %108 = vector.load %arg22[%c0_150, %c0_151] : memref<16x128xf32, #tpu.memory_space<vmem>>, vector<8x128xf32>
    %c0_152 = arith.constant 0 : index
    %c0_153 = arith.constant 0 : index
    %109 = vector.load %arg5[%c0_152, %c0_153] : memref<128x128xf32, #tpu.memory_space<vmem>>, vector<128x128xf32>
    %cst_154 = arith.constant dense<0.000000e+00> : vector<8x128xf32>
    %110 = tpu.matmul %108, %109, %cst_154 {dimension_numbers = #tpu.dot_dimension_numbers<[1], [0], [0], [1], [0, 0, 1, 1], [], []>} : vector<8x128xf32>, vector<128x128xf32>, vector<8x128xf32> -> vector<8x128xf32>
    %c0_155 = arith.constant 0 : index
    %c0_156 = arith.constant 0 : index
    %111 = vector.load %arg23[%c0_155, %c0_156] : memref<16x128xf32, #tpu.memory_space<vmem>>, vector<8x128xf32>
    tpu.vector_store %arg23[%c0_155, %c0_156], %110 {strides = array<i32>} : memref<16x128xf32, #tpu.memory_space<vmem>>, vector<8x128xf32>,
    %c0_157 = arith.constant 0 : index
    %c0_158 = arith.constant 0 : index
    %112 = vector.load %arg21[%c0_157, %c0_158] : memref<16x128xf32, #tpu.memory_space<vmem>>, vector<2x128xf32>
    %c0_159 = arith.constant 0 : index
    %c0_160 = arith.constant 0 : index
    %113 = vector.load %arg22[%c0_159, %c0_160] : memref<16x128xf32, #tpu.memory_space<vmem>>, vector<2x128xf32>
    tpu.vector_store %arg22[%c0_159, %c0_160], %112 {strides = array<i32>} : memref<16x128xf32, #tpu.memory_space<vmem>>, vector<2x128xf32>,
    %c4_161 = arith.constant 4 : index
    %c0_162 = arith.constant 0 : index
    %114 = vector.load %arg21[%c4_161, %c0_162] : memref<16x128xf32, #tpu.memory_space<vmem>>, vector<2x128xf32>
    %c2_163 = arith.constant 2 : index
    %c0_164 = arith.constant 0 : index
    %115 = vector.load %arg22[%c2_163, %c0_164] : memref<16x128xf32, #tpu.memory_space<vmem>>, vector<2x128xf32>
    tpu.vector_store %arg22[%c2_163, %c0_164], %114 {strides = array<i32>} : memref<16x128xf32, #tpu.memory_space<vmem>>, vector<2x128xf32>,
    %c8_165 = arith.constant 8 : index
    %c0_166 = arith.constant 0 : index
    %116 = vector.load %arg21[%c8_165, %c0_166] : memref<16x128xf32, #tpu.memory_space<vmem>>, vector<2x128xf32>
    %c4_167 = arith.constant 4 : index
    %c0_168 = arith.constant 0 : index
    %117 = vector.load %arg22[%c4_167, %c0_168] : memref<16x128xf32, #tpu.memory_space<vmem>>, vector<2x128xf32>
    tpu.vector_store %arg22[%c4_167, %c0_168], %116 {strides = array<i32>} : memref<16x128xf32, #tpu.memory_space<vmem>>, vector<2x128xf32>,
    %c12_169 = arith.constant 12 : index
    %c0_170 = arith.constant 0 : index
    %118 = vector.load %arg21[%c12_169, %c0_170] : memref<16x128xf32, #tpu.memory_space<vmem>>, vector<2x128xf32>
    %c6_171 = arith.constant 6 : index
    %c0_172 = arith.constant 0 : index
    %119 = vector.load %arg22[%c6_171, %c0_172] : memref<16x128xf32, #tpu.memory_space<vmem>>, vector<2x128xf32>
    tpu.vector_store %arg22[%c6_171, %c0_172], %118 {strides = array<i32>} : memref<16x128xf32, #tpu.memory_space<vmem>>, vector<2x128xf32>,
    %c0_173 = arith.constant 0 : index
    %c0_174 = arith.constant 0 : index
    %120 = vector.load %arg22[%c0_173, %c0_174] : memref<16x128xf32, #tpu.memory_space<vmem>>, vector<8x128xf32>
    %c0_175 = arith.constant 0 : index
    %c0_176 = arith.constant 0 : index
    %121 = vector.load %arg6[%c0_175, %c0_176] : memref<128x128xf32, #tpu.memory_space<vmem>>, vector<128x128xf32>
    %cst_177 = arith.constant dense<0.000000e+00> : vector<8x128xf32>
    %122 = tpu.matmul %120, %121, %cst_177 {dimension_numbers = #tpu.dot_dimension_numbers<[1], [0], [0], [1], [0, 0, 1, 1], [], []>} : vector<8x128xf32>, vector<128x128xf32>, vector<8x128xf32> -> vector<8x128xf32>
    %c0_178 = arith.constant 0 : index
    %c0_179 = arith.constant 0 : index
    %123 = vector.load %arg23[%c0_178, %c0_179] : memref<16x128xf32, #tpu.memory_space<vmem>>, vector<8x128xf32>
    %124 = arith.addf %123, %122 : vector<8x128xf32>
    %c0_180 = arith.constant 0 : index
    %c0_181 = arith.constant 0 : index
    %125 = vector.load %arg23[%c0_180, %c0_181] : memref<16x128xf32, #tpu.memory_space<vmem>>, vector<8x128xf32>
    tpu.vector_store %arg23[%c0_180, %c0_181], %124 {strides = array<i32>} : memref<16x128xf32, #tpu.memory_space<vmem>>, vector<8x128xf32>,
    %c2_182 = arith.constant 2 : index
    %c0_183 = arith.constant 0 : index
    %126 = vector.load %arg21[%c2_182, %c0_183] : memref<16x128xf32, #tpu.memory_space<vmem>>, vector<2x128xf32>
    %c0_184 = arith.constant 0 : index
    %c0_185 = arith.constant 0 : index
    %127 = vector.load %arg22[%c0_184, %c0_185] : memref<16x128xf32, #tpu.memory_space<vmem>>, vector<2x128xf32>
    tpu.vector_store %arg22[%c0_184, %c0_185], %126 {strides = array<i32>} : memref<16x128xf32, #tpu.memory_space<vmem>>, vector<2x128xf32>,
    %c6_186 = arith.constant 6 : index
    %c0_187 = arith.constant 0 : index
    %128 = vector.load %arg21[%c6_186, %c0_187] : memref<16x128xf32, #tpu.memory_space<vmem>>, vector<2x128xf32>
    %c2_188 = arith.constant 2 : index
    %c0_189 = arith.constant 0 : index
    %129 = vector.load %arg22[%c2_188, %c0_189] : memref<16x128xf32, #tpu.memory_space<vmem>>, vector<2x128xf32>
    tpu.vector_store %arg22[%c2_188, %c0_189], %128 {strides = array<i32>} : memref<16x128xf32, #tpu.memory_space<vmem>>, vector<2x128xf32>,
    %c10_190 = arith.constant 10 : index
    %c0_191 = arith.constant 0 : index
    %130 = vector.load %arg21[%c10_190, %c0_191] : memref<16x128xf32, #tpu.memory_space<vmem>>, vector<2x128xf32>
    %c4_192 = arith.constant 4 : index
    %c0_193 = arith.constant 0 : index
    %131 = vector.load %arg22[%c4_192, %c0_193] : memref<16x128xf32, #tpu.memory_space<vmem>>, vector<2x128xf32>
    tpu.vector_store %arg22[%c4_192, %c0_193], %130 {strides = array<i32>} : memref<16x128xf32, #tpu.memory_space<vmem>>, vector<2x128xf32>,
    %c14_194 = arith.constant 14 : index
    %c0_195 = arith.constant 0 : index
    %132 = vector.load %arg21[%c14_194, %c0_195] : memref<16x128xf32, #tpu.memory_space<vmem>>, vector<2x128xf32>
    %c6_196 = arith.constant 6 : index
    %c0_197 = arith.constant 0 : index
    %133 = vector.load %arg22[%c6_196, %c0_197] : memref<16x128xf32, #tpu.memory_space<vmem>>, vector<2x128xf32>
    tpu.vector_store %arg22[%c6_196, %c0_197], %132 {strides = array<i32>} : memref<16x128xf32, #tpu.memory_space<vmem>>, vector<2x128xf32>,
    %c0_198 = arith.constant 0 : index
    %c0_199 = arith.constant 0 : index
    %134 = vector.load %arg22[%c0_198, %c0_199] : memref<16x128xf32, #tpu.memory_space<vmem>>, vector<8x128xf32>
    %c0_200 = arith.constant 0 : index
    %c0_201 = arith.constant 0 : index
    %135 = vector.load %arg7[%c0_200, %c0_201] : memref<128x128xf32, #tpu.memory_space<vmem>>, vector<128x128xf32>
    %cst_202 = arith.constant dense<0.000000e+00> : vector<8x128xf32>
    %136 = tpu.matmul %134, %135, %cst_202 {dimension_numbers = #tpu.dot_dimension_numbers<[1], [0], [0], [1], [0, 0, 1, 1], [], []>} : vector<8x128xf32>, vector<128x128xf32>, vector<8x128xf32> -> vector<8x128xf32>
    %c0_203 = arith.constant 0 : index
    %c0_204 = arith.constant 0 : index
    %137 = vector.load %arg23[%c0_203, %c0_204] : memref<16x128xf32, #tpu.memory_space<vmem>>, vector<8x128xf32>
    %138 = arith.addf %137, %136 : vector<8x128xf32>
    %c0_205 = arith.constant 0 : index
    %c0_206 = arith.constant 0 : index
    %139 = vector.load %arg23[%c0_205, %c0_206] : memref<16x128xf32, #tpu.memory_space<vmem>>, vector<8x128xf32>
    tpu.vector_store %arg23[%c0_205, %c0_206], %138 {strides = array<i32>} : memref<16x128xf32, #tpu.memory_space<vmem>>, vector<8x128xf32>,
    %c0_207 = arith.constant 0 : index
    %c0_208 = arith.constant 0 : index
    %140 = vector.load %arg23[%c0_207, %c0_208] : memref<16x128xf32, #tpu.memory_space<vmem>>, vector<8x128xf32>
    %c0_209 = arith.constant 0 : index
    %c0_210 = arith.constant 0 : index
    %141 = vector.load %arg15[%c0_209, %c0_210] : memref<1x128xf32, #tpu.memory_space<vmem>>, vector<1x128xf32>
    %142 = vector.broadcast %141 : vector<1x128xf32> to vector<8x128xf32>
    %143 = arith.addf %140, %142 : vector<8x128xf32>
    %cst_211 = arith.constant 0.000000e+00 : f32
    %144 = vector.broadcast %cst_211 : f32 to vector<8x128xf32>
    %145 = arith.cmpf ogt, %143, %144 : vector<8x128xf32>
    %cst_212 = arith.constant 0.000000e+00 : f32
    %146 = vector.broadcast %cst_212 : f32 to vector<8x128xf32>
    %147 = arith.minimumf %143, %146 : vector<8x128xf32>
    %148 = math.exp %147 : vector<8x128xf32>
    %cst_213 = arith.constant 1.000000e+00 : f32
    %149 = vector.broadcast %cst_213 : f32 to vector<8x128xf32>
    %150 = arith.subf %148, %149 : vector<8x128xf32>
    %151 = arith.select %145, %143, %150 : vector<8x128xi1>, vector<8x128xf32>
    %c0_214 = arith.constant 0 : index
    %c0_215 = arith.constant 0 : index
    %152 = vector.load %arg21[%c0_214, %c0_215] : memref<16x128xf32, #tpu.memory_space<vmem>>, vector<8x128xf32>
    tpu.vector_store %arg21[%c0_214, %c0_215], %151 {strides = array<i32>} : memref<16x128xf32, #tpu.memory_space<vmem>>, vector<8x128xf32>,
    %cst_216 = arith.constant 0.000000e+00 : f32
    %153 = vector.broadcast %cst_216 : f32 to vector<2x128xf32>
    %c0_217 = arith.constant 0 : index
    %c0_218 = arith.constant 0 : index
    %154 = vector.load %arg22[%c0_217, %c0_218] : memref<16x128xf32, #tpu.memory_space<vmem>>, vector<2x128xf32>
    tpu.vector_store %arg22[%c0_217, %c0_218], %153 {strides = array<i32>} : memref<16x128xf32, #tpu.memory_space<vmem>>, vector<2x128xf32>,
    %c2_219 = arith.constant 2 : index
    %c0_220 = arith.constant 0 : index
    %155 = vector.load %arg21[%c2_219, %c0_220] : memref<16x128xf32, #tpu.memory_space<vmem>>, vector<2x128xf32>
    %c2_221 = arith.constant 2 : index
    %c0_222 = arith.constant 0 : index
    %156 = vector.load %arg22[%c2_221, %c0_222] : memref<16x128xf32, #tpu.memory_space<vmem>>, vector<2x128xf32>
    tpu.vector_store %arg22[%c2_221, %c0_222], %155 {strides = array<i32>} : memref<16x128xf32, #tpu.memory_space<vmem>>, vector<2x128xf32>,
    %c0_223 = arith.constant 0 : index
    %c0_224 = arith.constant 0 : index
    %157 = vector.load %arg22[%c0_223, %c0_224] : memref<16x128xf32, #tpu.memory_space<vmem>>, vector<4x128xf32>
    %c0_225 = arith.constant 0 : index
    %c0_226 = arith.constant 0 : index
    %158 = vector.load %arg8[%c0_225, %c0_226] : memref<128x128xf32, #tpu.memory_space<vmem>>, vector<128x128xf32>
    %cst_227 = arith.constant dense<0.000000e+00> : vector<4x128xf32>
    %159 = tpu.matmul %157, %158, %cst_227 {dimension_numbers = #tpu.dot_dimension_numbers<[1], [0], [0], [1], [0, 0, 1, 1], [], []>} : vector<4x128xf32>, vector<128x128xf32>, vector<4x128xf32> -> vector<4x128xf32>
    %c0_228 = arith.constant 0 : index
    %c0_229 = arith.constant 0 : index
    %160 = vector.load %arg23[%c0_228, %c0_229] : memref<16x128xf32, #tpu.memory_space<vmem>>, vector<4x128xf32>
    tpu.vector_store %arg23[%c0_228, %c0_229], %159 {strides = array<i32>} : memref<16x128xf32, #tpu.memory_space<vmem>>, vector<4x128xf32>,
    %c0_230 = arith.constant 0 : index
    %c0_231 = arith.constant 0 : index
    %161 = vector.load %arg21[%c0_230, %c0_231] : memref<16x128xf32, #tpu.memory_space<vmem>>, vector<2x128xf32>
    %c0_232 = arith.constant 0 : index
    %c0_233 = arith.constant 0 : index
    %162 = vector.load %arg22[%c0_232, %c0_233] : memref<16x128xf32, #tpu.memory_space<vmem>>, vector<2x128xf32>
    tpu.vector_store %arg22[%c0_232, %c0_233], %161 {strides = array<i32>} : memref<16x128xf32, #tpu.memory_space<vmem>>, vector<2x128xf32>,
    %c4_234 = arith.constant 4 : index
    %c0_235 = arith.constant 0 : index
    %163 = vector.load %arg21[%c4_234, %c0_235] : memref<16x128xf32, #tpu.memory_space<vmem>>, vector<2x128xf32>
    %c2_236 = arith.constant 2 : index
    %c0_237 = arith.constant 0 : index
    %164 = vector.load %arg22[%c2_236, %c0_237] : memref<16x128xf32, #tpu.memory_space<vmem>>, vector<2x128xf32>
    tpu.vector_store %arg22[%c2_236, %c0_237], %163 {strides = array<i32>} : memref<16x128xf32, #tpu.memory_space<vmem>>, vector<2x128xf32>,
    %c0_238 = arith.constant 0 : index
    %c0_239 = arith.constant 0 : index
    %165 = vector.load %arg22[%c0_238, %c0_239] : memref<16x128xf32, #tpu.memory_space<vmem>>, vector<4x128xf32>
    %c0_240 = arith.constant 0 : index
    %c0_241 = arith.constant 0 : index
    %166 = vector.load %arg9[%c0_240, %c0_241] : memref<128x128xf32, #tpu.memory_space<vmem>>, vector<128x128xf32>
    %cst_242 = arith.constant dense<0.000000e+00> : vector<4x128xf32>
    %167 = tpu.matmul %165, %166, %cst_242 {dimension_numbers = #tpu.dot_dimension_numbers<[1], [0], [0], [1], [0, 0, 1, 1], [], []>} : vector<4x128xf32>, vector<128x128xf32>, vector<4x128xf32> -> vector<4x128xf32>
    %c0_243 = arith.constant 0 : index
    %c0_244 = arith.constant 0 : index
    %168 = vector.load %arg23[%c0_243, %c0_244] : memref<16x128xf32, #tpu.memory_space<vmem>>, vector<4x128xf32>
    %169 = arith.addf %168, %167 : vector<4x128xf32>
    %c0_245 = arith.constant 0 : index
    %c0_246 = arith.constant 0 : index
    %170 = vector.load %arg23[%c0_245, %c0_246] : memref<16x128xf32, #tpu.memory_space<vmem>>, vector<4x128xf32>
    tpu.vector_store %arg23[%c0_245, %c0_246], %169 {strides = array<i32>} : memref<16x128xf32, #tpu.memory_space<vmem>>, vector<4x128xf32>,
    %c2_247 = arith.constant 2 : index
    %c0_248 = arith.constant 0 : index
    %171 = vector.load %arg21[%c2_247, %c0_248] : memref<16x128xf32, #tpu.memory_space<vmem>>, vector<2x128xf32>
    %c0_249 = arith.constant 0 : index
    %c0_250 = arith.constant 0 : index
    %172 = vector.load %arg22[%c0_249, %c0_250] : memref<16x128xf32, #tpu.memory_space<vmem>>, vector<2x128xf32>
    tpu.vector_store %arg22[%c0_249, %c0_250], %171 {strides = array<i32>} : memref<16x128xf32, #tpu.memory_space<vmem>>, vector<2x128xf32>,
    %c6_251 = arith.constant 6 : index
    %c0_252 = arith.constant 0 : index
    %173 = vector.load %arg21[%c6_251, %c0_252] : memref<16x128xf32, #tpu.memory_space<vmem>>, vector<2x128xf32>
    %c2_253 = arith.constant 2 : index
    %c0_254 = arith.constant 0 : index
    %174 = vector.load %arg22[%c2_253, %c0_254] : memref<16x128xf32, #tpu.memory_space<vmem>>, vector<2x128xf32>
    tpu.vector_store %arg22[%c2_253, %c0_254], %173 {strides = array<i32>} : memref<16x128xf32, #tpu.memory_space<vmem>>, vector<2x128xf32>,
    %c0_255 = arith.constant 0 : index
    %c0_256 = arith.constant 0 : index
    %175 = vector.load %arg22[%c0_255, %c0_256] : memref<16x128xf32, #tpu.memory_space<vmem>>, vector<4x128xf32>
    %c0_257 = arith.constant 0 : index
    %c0_258 = arith.constant 0 : index
    %176 = vector.load %arg10[%c0_257, %c0_258] : memref<128x128xf32, #tpu.memory_space<vmem>>, vector<128x128xf32>
    %cst_259 = arith.constant dense<0.000000e+00> : vector<4x128xf32>
    %177 = tpu.matmul %175, %176, %cst_259 {dimension_numbers = #tpu.dot_dimension_numbers<[1], [0], [0], [1], [0, 0, 1, 1], [], []>} : vector<4x128xf32>, vector<128x128xf32>, vector<4x128xf32> -> vector<4x128xf32>
    %c0_260 = arith.constant 0 : index
    %c0_261 = arith.constant 0 : index
    %178 = vector.load %arg23[%c0_260, %c0_261] : memref<16x128xf32, #tpu.memory_space<vmem>>, vector<4x128xf32>
    %179 = arith.addf %178, %177 : vector<4x128xf32>
    %c0_262 = arith.constant 0 : index
    %c0_263 = arith.constant 0 : index
    %180 = vector.load %arg23[%c0_262, %c0_263] : memref<16x128xf32, #tpu.memory_space<vmem>>, vector<4x128xf32>
    tpu.vector_store %arg23[%c0_262, %c0_263], %179 {strides = array<i32>} : memref<16x128xf32, #tpu.memory_space<vmem>>, vector<4x128xf32>,
    %c0_264 = arith.constant 0 : index
    %c0_265 = arith.constant 0 : index
    %181 = vector.load %arg23[%c0_264, %c0_265] : memref<16x128xf32, #tpu.memory_space<vmem>>, vector<4x128xf32>
    %c0_266 = arith.constant 0 : index
    %c0_267 = arith.constant 0 : index
    %182 = vector.load %arg16[%c0_266, %c0_267] : memref<1x128xf32, #tpu.memory_space<vmem>>, vector<1x128xf32>
    %183 = vector.broadcast %182 : vector<1x128xf32> to vector<4x128xf32>
    %184 = arith.addf %181, %183 : vector<4x128xf32>
    %cst_268 = arith.constant 0.000000e+00 : f32
    %185 = vector.broadcast %cst_268 : f32 to vector<4x128xf32>
    %186 = arith.cmpf ogt, %184, %185 : vector<4x128xf32>
    %cst_269 = arith.constant 0.000000e+00 : f32
    %187 = vector.broadcast %cst_269 : f32 to vector<4x128xf32>
    %188 = arith.minimumf %184, %187 : vector<4x128xf32>
    %189 = math.exp %188 : vector<4x128xf32>
    %cst_270 = arith.constant 1.000000e+00 : f32
    %190 = vector.broadcast %cst_270 : f32 to vector<4x128xf32>
    %191 = arith.subf %189, %190 : vector<4x128xf32>
    %192 = arith.select %186, %184, %191 : vector<4x128xi1>, vector<4x128xf32>
    %c0_271 = arith.constant 0 : index
    %c0_272 = arith.constant 0 : index
    %193 = vector.load %arg21[%c0_271, %c0_272] : memref<16x128xf32, #tpu.memory_space<vmem>>, vector<4x128xf32>
    tpu.vector_store %arg21[%c0_271, %c0_272], %192 {strides = array<i32>} : memref<16x128xf32, #tpu.memory_space<vmem>>, vector<4x128xf32>,
    %cst_273 = arith.constant 0.000000e+00 : f32
    %194 = vector.broadcast %cst_273 : f32 to vector<2x128xf32>
    %c0_274 = arith.constant 0 : index
    %c0_275 = arith.constant 0 : index
    %195 = vector.load %arg22[%c0_274, %c0_275] : memref<16x128xf32, #tpu.memory_space<vmem>>, vector<2x128xf32>
    tpu.vector_store %arg22[%c0_274, %c0_275], %194 {strides = array<i32>} : memref<16x128xf32, #tpu.memory_space<vmem>>, vector<2x128xf32>,
    %c0_276 = arith.constant 0 : index
    %c0_277 = arith.constant 0 : index
    %196 = vector.load %arg21[%c0_276, %c0_277] : memref<16x128xf32, #tpu.memory_space<vmem>>, vector<2x128xf32>
    %c2_278 = arith.constant 2 : index
    %c0_279 = arith.constant 0 : index
    %197 = vector.load %arg22[%c2_278, %c0_279] : memref<16x128xf32, #tpu.memory_space<vmem>>, vector<2x128xf32>
    tpu.vector_store %arg22[%c2_278, %c0_279], %196 {strides = array<i32>} : memref<16x128xf32, #tpu.memory_space<vmem>>, vector<2x128xf32>,
    %c0_280 = arith.constant 0 : index
    %c0_281 = arith.constant 0 : index
    %198 = vector.load %arg22[%c0_280, %c0_281] : memref<16x128xf32, #tpu.memory_space<vmem>>, vector<4x128xf32>
    %c0_282 = arith.constant 0 : index
    %c0_283 = arith.constant 0 : index
    %199 = vector.load %arg11[%c0_282, %c0_283] : memref<128x128xf32, #tpu.memory_space<vmem>>, vector<128x128xf32>
    %cst_284 = arith.constant dense<0.000000e+00> : vector<4x128xf32>
    %200 = tpu.matmul %198, %199, %cst_284 {dimension_numbers = #tpu.dot_dimension_numbers<[1], [0], [0], [1], [0, 0, 1, 1], [], []>} : vector<4x128xf32>, vector<128x128xf32>, vector<4x128xf32> -> vector<4x128xf32>
    %c0_285 = arith.constant 0 : index
    %c0_286 = arith.constant 0 : index
    %201 = vector.load %arg23[%c0_285, %c0_286] : memref<16x128xf32, #tpu.memory_space<vmem>>, vector<4x128xf32>
    tpu.vector_store %arg23[%c0_285, %c0_286], %200 {strides = array<i32>} : memref<16x128xf32, #tpu.memory_space<vmem>>, vector<4x128xf32>,
    %c0_287 = arith.constant 0 : index
    %c0_288 = arith.constant 0 : index
    %202 = vector.load %arg21[%c0_287, %c0_288] : memref<16x128xf32, #tpu.memory_space<vmem>>, vector<2x128xf32>
    %c0_289 = arith.constant 0 : index
    %c0_290 = arith.constant 0 : index
    %203 = vector.load %arg22[%c0_289, %c0_290] : memref<16x128xf32, #tpu.memory_space<vmem>>, vector<2x128xf32>
    tpu.vector_store %arg22[%c0_289, %c0_290], %202 {strides = array<i32>} : memref<16x128xf32, #tpu.memory_space<vmem>>, vector<2x128xf32>,
    %c2_291 = arith.constant 2 : index
    %c0_292 = arith.constant 0 : index
    %204 = vector.load %arg21[%c2_291, %c0_292] : memref<16x128xf32, #tpu.memory_space<vmem>>, vector<2x128xf32>
    %c2_293 = arith.constant 2 : index
    %c0_294 = arith.constant 0 : index
    %205 = vector.load %arg22[%c2_293, %c0_294] : memref<16x128xf32, #tpu.memory_space<vmem>>, vector<2x128xf32>
    tpu.vector_store %arg22[%c2_293, %c0_294], %204 {strides = array<i32>} : memref<16x128xf32, #tpu.memory_space<vmem>>, vector<2x128xf32>,
    %c0_295 = arith.constant 0 : index
    %c0_296 = arith.constant 0 : index
    %206 = vector.load %arg22[%c0_295, %c0_296] : memref<16x128xf32, #tpu.memory_space<vmem>>, vector<4x128xf32>
    %c0_297 = arith.constant 0 : index
    %c0_298 = arith.constant 0 : index
    %207 = vector.load %arg12[%c0_297, %c0_298] : memref<128x128xf32, #tpu.memory_space<vmem>>, vector<128x128xf32>
    %cst_299 = arith.constant dense<0.000000e+00> : vector<4x128xf32>
    %208 = tpu.matmul %206, %207, %cst_299 {dimension_numbers = #tpu.dot_dimension_numbers<[1], [0], [0], [1], [0, 0, 1, 1], [], []>} : vector<4x128xf32>, vector<128x128xf32>, vector<4x128xf32> -> vector<4x128xf32>
    %c0_300 = arith.constant 0 : index
    %c0_301 = arith.constant 0 : index
    %209 = vector.load %arg23[%c0_300, %c0_301] : memref<16x128xf32, #tpu.memory_space<vmem>>, vector<4x128xf32>
    %210 = arith.addf %209, %208 : vector<4x128xf32>
    %c0_302 = arith.constant 0 : index
    %c0_303 = arith.constant 0 : index
    %211 = vector.load %arg23[%c0_302, %c0_303] : memref<16x128xf32, #tpu.memory_space<vmem>>, vector<4x128xf32>
    tpu.vector_store %arg23[%c0_302, %c0_303], %210 {strides = array<i32>} : memref<16x128xf32, #tpu.memory_space<vmem>>, vector<4x128xf32>,
    %c2_304 = arith.constant 2 : index
    %c0_305 = arith.constant 0 : index
    %212 = vector.load %arg21[%c2_304, %c0_305] : memref<16x128xf32, #tpu.memory_space<vmem>>, vector<2x128xf32>
    %c0_306 = arith.constant 0 : index
    %c0_307 = arith.constant 0 : index
    %213 = vector.load %arg22[%c0_306, %c0_307] : memref<16x128xf32, #tpu.memory_space<vmem>>, vector<2x128xf32>
    tpu.vector_store %arg22[%c0_306, %c0_307], %212 {strides = array<i32>} : memref<16x128xf32, #tpu.memory_space<vmem>>, vector<2x128xf32>,
    %cst_308 = arith.constant 0.000000e+00 : f32
    %214 = vector.broadcast %cst_308 : f32 to vector<2x128xf32>
    %c2_309 = arith.constant 2 : index
    %c0_310 = arith.constant 0 : index
    %215 = vector.load %arg22[%c2_309, %c0_310] : memref<16x128xf32, #tpu.memory_space<vmem>>, vector<2x128xf32>
    tpu.vector_store %arg22[%c2_309, %c0_310], %214 {strides = array<i32>} : memref<16x128xf32, #tpu.memory_space<vmem>>, vector<2x128xf32>,
    %c0_311 = arith.constant 0 : index
    %c0_312 = arith.constant 0 : index
    %216 = vector.load %arg22[%c0_311, %c0_312] : memref<16x128xf32, #tpu.memory_space<vmem>>, vector<4x128xf32>
    %c0_313 = arith.constant 0 : index
    %c0_314 = arith.constant 0 : index
    %217 = vector.load %arg13[%c0_313, %c0_314] : memref<128x128xf32, #tpu.memory_space<vmem>>, vector<128x128xf32>
    %cst_315 = arith.constant dense<0.000000e+00> : vector<4x128xf32>
    %218 = tpu.matmul %216, %217, %cst_315 {dimension_numbers = #tpu.dot_dimension_numbers<[1], [0], [0], [1], [0, 0, 1, 1], [], []>} : vector<4x128xf32>, vector<128x128xf32>, vector<4x128xf32> -> vector<4x128xf32>
    %c0_316 = arith.constant 0 : index
    %c0_317 = arith.constant 0 : index
    %219 = vector.load %arg23[%c0_316, %c0_317] : memref<16x128xf32, #tpu.memory_space<vmem>>, vector<4x128xf32>
    %220 = arith.addf %219, %218 : vector<4x128xf32>
    %c0_318 = arith.constant 0 : index
    %c0_319 = arith.constant 0 : index
    %221 = vector.load %arg23[%c0_318, %c0_319] : memref<16x128xf32, #tpu.memory_space<vmem>>, vector<4x128xf32>
    tpu.vector_store %arg23[%c0_318, %c0_319], %220 {strides = array<i32>} : memref<16x128xf32, #tpu.memory_space<vmem>>, vector<4x128xf32>,
    %c0_320 = arith.constant 0 : index
    %c0_321 = arith.constant 0 : index
    %222 = vector.load %arg23[%c0_320, %c0_321] : memref<16x128xf32, #tpu.memory_space<vmem>>, vector<4x128xf32>
    %c0_322 = arith.constant 0 : index
    %c0_323 = arith.constant 0 : index
    %223 = vector.load %arg17[%c0_322, %c0_323] : memref<1x128xf32, #tpu.memory_space<vmem>>, vector<1x128xf32>
    %224 = vector.broadcast %223 : vector<1x128xf32> to vector<4x128xf32>
    %225 = arith.addf %222, %224 : vector<4x128xf32>
    %cst_324 = arith.constant 0.000000e+00 : f32
    %226 = vector.broadcast %cst_324 : f32 to vector<4x128xf32>
    %227 = arith.cmpf ogt, %225, %226 : vector<4x128xf32>
    %cst_325 = arith.constant 0.000000e+00 : f32
    %228 = vector.broadcast %cst_325 : f32 to vector<4x128xf32>
    %229 = arith.minimumf %225, %228 : vector<4x128xf32>
    %230 = math.exp %229 : vector<4x128xf32>
    %cst_326 = arith.constant 1.000000e+00 : f32
    %231 = vector.broadcast %cst_326 : f32 to vector<4x128xf32>
    %232 = arith.subf %230, %231 : vector<4x128xf32>
    %233 = arith.select %227, %225, %232 : vector<4x128xi1>, vector<4x128xf32>
    %c0_327 = arith.constant 0 : index
    %c0_328 = arith.constant 0 : index
    %234 = vector.load %arg21[%c0_327, %c0_328] : memref<16x128xf32, #tpu.memory_space<vmem>>, vector<4x128xf32>
    tpu.vector_store %arg21[%c0_327, %c0_328], %233 {strides = array<i32>} : memref<16x128xf32, #tpu.memory_space<vmem>>, vector<4x128xf32>,
    %c0_329 = arith.constant 0 : index
    %c0_330 = arith.constant 0 : index
    %235 = vector.load %arg21[%c0_329, %c0_330] : memref<16x128xf32, #tpu.memory_space<vmem>>, vector<2x128xf32>
    %c0_331 = arith.constant 0 : index
    %c0_332 = arith.constant 0 : index
    %236 = vector.load %arg24[%c0_331, %c0_332] : memref<2x256xf32, #tpu.memory_space<vmem>>, vector<2x128xf32>
    tpu.vector_store %arg24[%c0_331, %c0_332], %235 {strides = array<i32>} : memref<2x256xf32, #tpu.memory_space<vmem>>, vector<2x128xf32>,
    %c2_333 = arith.constant 2 : index
    %c0_334 = arith.constant 0 : index
    %237 = vector.load %arg21[%c2_333, %c0_334] : memref<16x128xf32, #tpu.memory_space<vmem>>, vector<2x128xf32>
    %c0_335 = arith.constant 0 : index
    %c128 = arith.constant 128 : index
    %238 = vector.load %arg24[%c0_335, %c128] : memref<2x256xf32, #tpu.memory_space<vmem>>, vector<2x128xf32>
    tpu.vector_store %arg24[%c0_335, %c128], %237 {strides = array<i32>} : memref<2x256xf32, #tpu.memory_space<vmem>>, vector<2x128xf32>,
    %c0_336 = arith.constant 0 : index
    %c0_337 = arith.constant 0 : index
    %239 = vector.load %arg24[%c0_336, %c0_337] : memref<2x256xf32, #tpu.memory_space<vmem>>, vector<2x256xf32>
    %c0_338 = arith.constant 0 : index
    %c0_339 = arith.constant 0 : index
    %240 = vector.load %arg18[%c0_338, %c0_339] : memref<256x128xf32, #tpu.memory_space<vmem>>, vector<256x128xf32>
    %cst_340 = arith.constant dense<0.000000e+00> : vector<2x128xf32>
    %241 = tpu.matmul %239, %240, %cst_340 {dimension_numbers = #tpu.dot_dimension_numbers<[1], [0], [0], [1], [0, 0, 1, 1], [], []>} : vector<2x256xf32>, vector<256x128xf32>, vector<2x128xf32> -> vector<2x128xf32>
    %c0_341 = arith.constant 0 : index
    %c0_342 = arith.constant 0 : index
    %242 = vector.load %arg19[%c0_341, %c0_342] : memref<1x128xf32, #tpu.memory_space<vmem>>, vector<1x128xf32>
    %243 = vector.broadcast %242 : vector<1x128xf32> to vector<2x128xf32>
    %244 = arith.addf %241, %243 : vector<2x128xf32>
    %c0_343 = arith.constant 0 : index
    %c0_344 = arith.constant 0 : index
    %245 = vector.load %arg20[%c0_343, %c0_344] : memref<2x128xf32, #tpu.memory_space<vmem>>, vector<2x128xf32>
    tpu.vector_store %arg20[%c0_343, %c0_344], %244 {strides = array<i32>} : memref<2x128xf32, #tpu.memory_space<vmem>>, vector<2x128xf32>,
    return
  }
  func.func @transform_0(%arg0: i32) -> (i32, i32, i32) {
    %c0_i32 = arith.constant 0 : i32
    %c0_i32_0 = arith.constant 0 : i32
    %c0_i32_1 = arith.constant 0 : i32
    return %c0_i32, %arg0, %c0_i32_0 : i32, i32, i32
  }
  func.func @transform_1(%arg0: i32) -> (i32, i32) {
    %c0_i32 = arith.constant 0 : i32
    %c0_i32_0 = arith.constant 0 : i32
    %c0_i32_1 = arith.constant 0 : i32
    return %c0_i32, %c0_i32_0 : i32, i32
  }
  func.func @transform_2(%arg0: i32) -> (i32, i32) {
    %c0_i32 = arith.constant 0 : i32
    %c0_i32_0 = arith.constant 0 : i32
    %c0_i32_1 = arith.constant 0 : i32
    return %c0_i32, %c0_i32_0 : i32, i32
  }
  func.func @transform_3(%arg0: i32) -> (i32, i32) {
    %c0_i32 = arith.constant 0 : i32
    %c0_i32_0 = arith.constant 0 : i32
    %c0_i32_1 = arith.constant 0 : i32
    return %c0_i32, %c0_i32_0 : i32, i32
  }
  func.func @transform_4(%arg0: i32) -> (i32, i32) {
    %c0_i32 = arith.constant 0 : i32
    %c0_i32_0 = arith.constant 0 : i32
    %c0_i32_1 = arith.constant 0 : i32
    return %c0_i32, %c0_i32_0 : i32, i32
  }
  func.func @transform_5(%arg0: i32) -> (i32, i32) {
    %c0_i32 = arith.constant 0 : i32
    %c0_i32_0 = arith.constant 0 : i32
    %c0_i32_1 = arith.constant 0 : i32
    return %c0_i32, %c0_i32_0 : i32, i32
  }
  func.func @transform_6(%arg0: i32) -> (i32, i32) {
    %c0_i32 = arith.constant 0 : i32
    %c0_i32_0 = arith.constant 0 : i32
    %c0_i32_1 = arith.constant 0 : i32
    return %c0_i32, %c0_i32_0 : i32, i32
  }
  func.func @transform_7(%arg0: i32) -> (i32, i32) {
    %c0_i32 = arith.constant 0 : i32
    %c0_i32_0 = arith.constant 0 : i32
    %c0_i32_1 = arith.constant 0 : i32
    return %c0_i32, %c0_i32_0 : i32, i32
  }
  func.func @transform_8(%arg0: i32) -> (i32, i32) {
    %c0_i32 = arith.constant 0 : i32
    %c0_i32_0 = arith.constant 0 : i32
    %c0_i32_1 = arith.constant 0 : i32
    return %c0_i32, %c0_i32_0 : i32, i32
  }
  func.func @transform_9(%arg0: i32) -> (i32, i32) {
    %c0_i32 = arith.constant 0 : i32
    %c0_i32_0 = arith.constant 0 : i32
    %c0_i32_1 = arith.constant 0 : i32
    return %c0_i32, %c0_i32_0 : i32, i32
  }
  func.func @transform_10(%arg0: i32) -> (i32, i32) {
    %c0_i32 = arith.constant 0 : i32
    %c0_i32_0 = arith.constant 0 : i32
    %c0_i32_1 = arith.constant 0 : i32
    return %c0_i32, %c0_i32_0 : i32, i32
  }
  func.func @transform_11(%arg0: i32) -> (i32, i32) {
    %c0_i32 = arith.constant 0 : i32
    %c0_i32_0 = arith.constant 0 : i32
    %c0_i32_1 = arith.constant 0 : i32
    return %c0_i32, %c0_i32_0 : i32, i32
  }
  func.func @transform_12(%arg0: i32) -> (i32, i32) {
    %c0_i32 = arith.constant 0 : i32
    %c0_i32_0 = arith.constant 0 : i32
    %c0_i32_1 = arith.constant 0 : i32
    return %c0_i32, %c0_i32_0 : i32, i32
  }
  func.func @transform_13(%arg0: i32) -> (i32, i32) {
    %c0_i32 = arith.constant 0 : i32
    %c0_i32_0 = arith.constant 0 : i32
    %c0_i32_1 = arith.constant 0 : i32
    return %c0_i32, %c0_i32_0 : i32, i32
  }
  func.func @transform_14(%arg0: i32) -> (i32, i32) {
    %c0_i32 = arith.constant 0 : i32
    %c0_i32_0 = arith.constant 0 : i32
    %c0_i32_1 = arith.constant 0 : i32
    return %c0_i32, %c0_i32_0 : i32, i32
  }
  func.func @transform_15(%arg0: i32) -> (i32, i32) {
    %c0_i32 = arith.constant 0 : i32
    %c0_i32_0 = arith.constant 0 : i32
    %c0_i32_1 = arith.constant 0 : i32
    return %c0_i32, %c0_i32_0 : i32, i32
  }
  func.func @transform_16(%arg0: i32) -> (i32, i32) {
    %c0_i32 = arith.constant 0 : i32
    %c0_i32_0 = arith.constant 0 : i32
    %c0_i32_1 = arith.constant 0 : i32
    return %c0_i32, %c0_i32_0 : i32, i32
  }
  func.func @transform_17(%arg0: i32) -> (i32, i32) {
    %c0_i32 = arith.constant 0 : i32
    %c0_i32_0 = arith.constant 0 : i32
    %c0_i32_1 = arith.constant 0 : i32
    return %c0_i32, %c0_i32_0 : i32, i32
  }
  func.func @transform_18(%arg0: i32) -> (i32, i32) {
    %c0_i32 = arith.constant 0 : i32
    %c0_i32_0 = arith.constant 0 : i32
    %c0_i32_1 = arith.constant 0 : i32
    return %c0_i32, %c0_i32_0 : i32, i32
  }
  func.func @transform_19(%arg0: i32) -> (i32, i32) {
    %c0_i32 = arith.constant 0 : i32
    %c0_i32_0 = arith.constant 0 : i32
    return %arg0, %c0_i32 : i32, i32
  }
}

</mosaic_0001>

<bundles_post_ra>
// kernel: encoder_forward.1
= control target key start
LH: loop header
LB: loop body
LE: loop exit
PB: predicated region body
PF: predicated region fallthrough
CT: control target
= control target key end

     0   :  { %s3651_s0 = inlined_call_operand.vmem [shape: f32[16,2,64], index: 0, kind: input, shape index: {}]   ;;  %s3652_s1 = inlined_call_operand.vmem [shape: f32[64,128], index: 1, kind: input, shape index: {}]   ;;  %s3653_s2 = inlined_call_operand.hbm [shape: f32[64,128], index: 2, kind: input, shape index: {}]   ;;  %s3654_s3 = inlined_call_operand.hbm [shape: f32[64,128], index: 3, kind: input, shape index: {}]   ;;  %s3655_s4 = inlined_call_operand.vmem [shape: f32[128,128], index: 4, kind: input, shape index: {}]   ;;  %s3656_s5 = inlined_call_operand.hbm [shape: f32[128,128], index: 5, kind: input, shape index: {}]   ;;  %s3657_s6 = inlined_call_operand.hbm [shape: f32[128,128], index: 6, kind: input, shape index: {}]   ;;  %s3658_s7 = inlined_call_operand.hbm [shape: f32[128,128], index: 7, kind: input, shape index: {}]   ;;  %s3659_s8 = inlined_call_operand.hbm [shape: f32[128,128], index: 8, kind: input, shape index: {}]   ;;  %s3660_s9 = inlined_call_operand.hbm [shape: f32[128,128], index: 9, kind: input, shape index: {}]   ;;  %s3661_s10 = inlined_call_operand.hbm [shape: f32[128,128], index: 10, kind: input, shape index: {}]   ;;  %s3662_s11 = inlined_call_operand.hbm [shape: f32[128,128], index: 11, kind: input, shape index: {}]   ;;  %s3663_s12 = inlined_call_operand.hbm [shape: f32[128,128], index: 12, kind: input, shape index: {}]   ;;  %s3664_s13 = inlined_call_operand.vmem [shape: f32[1,128], index: 13, kind: input, shape index: {}]   ;;  %s3665_s14 = inlined_call_operand.vmem [shape: f32[1,128], index: 14, kind: input, shape index: {}]   ;;  %s3666_s15 = inlined_call_operand.hbm [shape: f32[1,128], index: 15, kind: input, shape index: {}]   ;;  %s3667_s16 = inlined_call_operand.hbm [shape: f32[1,128], index: 16, kind: input, shape index: {}]   ;;  %s3668_s17 = inlined_call_operand.vmem [shape: f32[256,128], index: 17, kind: input, shape index: {}]   ;;  %s3669_s18 = inlined_call_operand.hbm [shape: f32[1,128], index: 18, kind: input, shape index: {}]   ;;  %s3670_s19 = inlined_call_operand.hbm [shape: f32[2,128], index: 19, kind: output, shape index: {}]  }
   0x1   :  { %3676 = sst [smem:[#allocation36_spill]] %s3651_s0 }
   0x2   :  { %3677 = sst [smem:[#allocation37_spill]] %s3652_s1 }
   0x3   :  { %3678 = sst [smem:[#allocation38_spill]] %s3653_s2 }
   0x4   :  { %3679 = sst [smem:[#allocation39_spill]] %s3654_s3 }
   0x5   :  { %3680 = sst [smem:[#allocation40_spill]] %s3670_s19 }
   0x6   :  { %24 = vsyncpa [#allocation7], 0 }
   0x7   :  { %25 = vsyncpa [#allocation10], 0 }
   0x8   :  { %26 = vsyncpa [#allocation13], 0 }
   0x9   :  { %27 = vsyncpa [#allocation16], 0 }
   0xa   :  { %28 = vsyncpa [#allocation19], 0 }
   0xb   :  { %29 = vsyncpa [#allocation22], 0 }
   0xc   :  { %30 = vsyncpa [#allocation25], 0 }
   0xd   :  { %31 = vsyncpa [#allocation8], 0  ;;  %s2938_s0 = smov [#allocation9]   ;;  %s2939_s20 = smov [#allocation12]  }
   0xe   :  { %s53_s30 = sshll.u32 %s2938_s0, 4  ;;  %s79_s21 = sshll.u32 %s2939_s20, 4  ;;  %s54_s30 = int_to_ptr.vmem [resolvable:$true] %s53_s30  ;;  %s3057_s21 = int_to_ptr.vmem [resolvable:$true] %s79_s21 }
   0xf   :  { %s3681_s2 = sld [smem:[#allocation39_spill]] }
  0x15   :  { %s2614_s23 = scalar_lea.hbm %s3681_s2, 1024 }
  0x16   :  { %p2615_p0 = scmp.ne.s32.totalorder %s3681_s2, %s2614_s23  ;;  %p2618_p1 = scmp.lt.u32.totalorder %s2614_s23, %s3681_s2 }
  0x18   :  { %p2620_p2 = pnand %p2618_p1, %p2615_p0 }
  0x1a   :  { %2623 = shalt.err (!%p2620_p2)
}
  0x1b   :  { %s2624_s27 = scalar_lea.vmem %s54_s30, 1024  ;;  %p2629_p4 = scmp.lt.s32.totalorder %s54_s30, %s54_s30 }
  0x1c   :  { %p2625_p3 = scmp.ne.s32.totalorder %s54_s30, %s2624_s27  ;;  %p2630_p5 = scmp.lt.s32.totalorder %s2624_s27, %s2624_s27 }
  0x1e   :  { %p2631_p6 = por %p2630_p5, %p2629_p4 }
  0x20   :  { %p2632_p7 = pnand %p2631_p6, %p2625_p3 }
  0x22   :  { %2635 = shalt.err (!%p2632_p7)
}
  0x23   :  { %s2940_s28 = smov 128   ;;  %s2941_s29 = smov 8  }
  0x24   :  { %59 = dma.hbm_to_vmem [thread:$0]  %s3681_s2, 1024, %s54_s30, [#allocation10], %s2940_s28, %s2940_s28, %s2941_s29  }
  0x25   :  { %s2636_s23 = scalar_lea.hbm %s3657_s6, 2048 }
  0x26   :  { %p2637_p8 = scmp.ne.s32.totalorder %s3657_s6, %s2636_s23  ;;  %p2640_p9 = scmp.lt.u32.totalorder %s2636_s23, %s3657_s6 }
  0x28   :  { %p2642_p10 = pnand %p2640_p9, %p2637_p8 }
  0x2a   :  { %2645 = shalt.err (!%p2642_p10)
}
  0x2b   :  { %s2646_s27 = scalar_lea.vmem %s3057_s21, 2048  ;;  %p2651_p12 = scmp.lt.s32.totalorder %s3057_s21, %s3057_s21 }
  0x2c   :  { %p2647_p11 = scmp.ne.s32.totalorder %s3057_s21, %s2646_s27  ;;  %p2652_p13 = scmp.lt.s32.totalorder %s2646_s27, %s2646_s27 }
  0x2e   :  { %p2653_p0 = por %p2652_p13, %p2651_p12 }
  0x30   :  { %p2654_p1 = pnand %p2653_p0, %p2647_p11 }
  0x32   :  { %2657 = shalt.err (!%p2654_p1)
}
  0x33   :  { %85 = dma.hbm_to_vmem [thread:$0]  %s3657_s6, 2048, %s3057_s21, [#allocation13], %s2940_s28, %s2940_s28, %s2941_s29  }
  0x34   :  { %s2942_s0 = smov [#allocation15]   ;;  %s2943_s1 = smov [#allocation18]  }
  0x35   :  { %s103_s20 = sshll.u32 %s2942_s0, 4  ;;  %s127_s22 = sshll.u32 %s2943_s1, 4  ;;  %s104_s20 = int_to_ptr.vmem [resolvable:$true] %s103_s20  ;;  %s3094_s22 = int_to_ptr.vmem [resolvable:$true] %s127_s22 }
  0x36   :  { %s2658_s25 = scalar_lea.hbm %s3659_s8, 2048 }
  0x37   :  { %p2659_p2 = scmp.ne.s32.totalorder %s3659_s8, %s2658_s25  ;;  %p2662_p3 = scmp.lt.u32.totalorder %s2658_s25, %s3659_s8 }
  0x39   :  { %p2664_p4 = pnand %p2662_p3, %p2659_p2 }
  0x3b   :  { %2667 = shalt.err (!%p2664_p4)
}
  0x3c   :  { %s2668_s6 = scalar_lea.vmem %s104_s20, 2048  ;;  %p2673_p6 = scmp.lt.s32.totalorder %s104_s20, %s104_s20 }
  0x3d   :  { %p2669_p5 = scmp.ne.s32.totalorder %s104_s20, %s2668_s6  ;;  %p2674_p7 = scmp.lt.s32.totalorder %s2668_s6, %s2668_s6 }
  0x3f   :  { %p2675_p8 = por %p2674_p7, %p2673_p6 }
  0x41   :  { %p2676_p9 = pnand %p2675_p8, %p2669_p5 }
  0x43   :  { %2679 = shalt.err (!%p2676_p9)
}
  0x44   :  { %109 = dma.hbm_to_vmem [thread:$0]  %s3659_s8, 2048, %s104_s20, [#allocation16], %s2940_s28, %s2940_s28, %s2941_s29  }
  0x45   :  { %s2680_s19 = scalar_lea.hbm %s3661_s10, 2048 }
  0x46   :  { %p2681_p10 = scmp.ne.s32.totalorder %s3661_s10, %s2680_s19  ;;  %p2684_p11 = scmp.lt.u32.totalorder %s2680_s19, %s3661_s10 }
  0x48   :  { %p2686_p12 = pnand %p2684_p11, %p2681_p10 }
  0x4a   :  { %2689 = shalt.err (!%p2686_p12)
}
  0x4b   :  { %s2690_s3 = scalar_lea.vmem %s3094_s22, 2048  ;;  %p2695_p0 = scmp.lt.s32.totalorder %s3094_s22, %s3094_s22 }
  0x4c   :  { %p2691_p13 = scmp.ne.s32.totalorder %s3094_s22, %s2690_s3  ;;  %p2696_p1 = scmp.lt.s32.totalorder %s2690_s3, %s2690_s3 }
  0x4e   :  { %p2697_p2 = por %p2696_p1, %p2695_p0 }
  0x50   :  { %p2698_p3 = pnand %p2697_p2, %p2691_p13 }
  0x52   :  { %2701 = shalt.err (!%p2698_p3)
}
  0x53   :  { %133 = dma.hbm_to_vmem [thread:$0]  %s3661_s10, 2048, %s3094_s22, [#allocation19], %s2940_s28, %s2940_s28, %s2941_s29  }
  0x54   :  { %s2944_s26 = smov [#allocation21]   ;;  %s2945_s6 = smov [#allocation24]  }
  0x55   :  { %s151_s27 = sshll.u32 %s2944_s26, 4  ;;  %s178_s21 = sshll.u32 %s2945_s6, 4  ;;  %s152_s27 = int_to_ptr.vmem [resolvable:$true] %s151_s27  ;;  %s179_s21 = int_to_ptr.vmem [resolvable:$true] %s178_s21 }
  0x56   :  { %s2702_s0 = scalar_lea.hbm %s3663_s12, 2048 }
  0x57   :  { %p2703_p4 = scmp.ne.s32.totalorder %s3663_s12, %s2702_s0  ;;  %p2706_p5 = scmp.lt.u32.totalorder %s2702_s0, %s3663_s12 }
  0x59   :  { %p2708_p6 = pnand %p2706_p5, %p2703_p4 }
  0x5b   :  { %2711 = shalt.err (!%p2708_p6)
}
  0x5c   :  { %s2712_s10 = scalar_lea.vmem %s152_s27, 2048  ;;  %p2717_p8 = scmp.lt.s32.totalorder %s152_s27, %s152_s27 }
  0x5d   :  { %p2713_p7 = scmp.ne.s32.totalorder %s152_s27, %s2712_s10  ;;  %p2718_p9 = scmp.lt.s32.totalorder %s2712_s10, %s2712_s10 }
  0x5f   :  { %p2719_p10 = por %p2718_p9, %p2717_p8 }
  0x61   :  { %p2720_p11 = pnand %p2719_p10, %p2713_p7 }
  0x63   :  { %2723 = shalt.err (!%p2720_p11)
}
  0x64   :  { %157 = dma.hbm_to_vmem [thread:$0]  %s3663_s12, 2048, %s152_s27, [#allocation22], %s2940_s28, %s2940_s28, %s2941_s29  }
  0x65   :  { %s2724_s20 = scalar_lea.hbm %s3667_s16, 16 }
  0x66   :  { %p2725_p12 = scmp.ne.s32.totalorder %s3667_s16, %s2724_s20  ;;  %p2728_p13 = scmp.lt.u32.totalorder %s2724_s20, %s3667_s16 }
  0x68   :  { %p2730_p0 = pnand %p2728_p13, %p2725_p12 }
  0x6a   :  { %2733 = shalt.err (!%p2730_p0)
}
  0x6b   :  { %s2734_s0 = scalar_lea.vmem %s179_s21, 16  ;;  %s2738_s19 = scalar_lea.vmem %s179_s21, 32 }
  0x6c   :  { %p2735_p1 = scmp.ne.s32.totalorder %s179_s21, %s2734_s0  ;;  %p2739_p2 = scmp.lt.s32.totalorder %s179_s21, %s179_s21 }
  0x6d   :  { %p2740_p3 = scmp.lt.s32.totalorder %s2738_s19, %s2734_s0 }
  0x6f   :  { %p2741_p4 = por %p2740_p3, %p2739_p2 }
  0x71   :  { %p2742_p5 = pnand %p2741_p4, %p2735_p1 }
  0x73   :  { %2745 = shalt.err (!%p2742_p5)
}
  0x74   :  { %181 = dma.hbm_to_vmem [thread:$0]  %s3667_s16, 16, %s179_s21, [#allocation25]  }
  0x75   :  { %s2946_s1 = smov [#allocation6]   ;;  %s2947_s24 = smov [#allocation11]  }
  0x76   :  { %s41_s23 = sshll.u32 %s2946_s1, 4  ;;  %s67_s10 = sshll.u32 %s2947_s24, 4  ;;  %s42_s23 = int_to_ptr.vmem [resolvable:$true] %s41_s23  ;;  %s3158_s10 = int_to_ptr.vmem [resolvable:$true] %s67_s10 }
  0x77   :  { %s3682_s3 = sld [smem:[#allocation38_spill]] }
  0x7d   :  { %s2746_s8 = scalar_lea.hbm %s3682_s3, 1024 }
  0x7e   :  { %p2747_p6 = scmp.ne.s32.totalorder %s3682_s3, %s2746_s8  ;;  %p2750_p7 = scmp.lt.u32.totalorder %s2746_s8, %s3682_s3 }
  0x80   :  { %p2752_p8 = pnand %p2750_p7, %p2747_p6 }
  0x82   :  { %2755 = shalt.err (!%p2752_p8)
}
  0x83   :  { %s2756_s16 = scalar_lea.vmem %s42_s23, 1024  ;;  %p2761_p10 = scmp.lt.s32.totalorder %s42_s23, %s42_s23 }
  0x84   :  { %p2757_p9 = scmp.ne.s32.totalorder %s42_s23, %s2756_s16  ;;  %p2762_p11 = scmp.lt.s32.totalorder %s2756_s16, %s2756_s16 }
  0x86   :  { %p2763_p12 = por %p2762_p11, %p2761_p10 }
  0x88   :  { %p2764_p13 = pnand %p2763_p12, %p2757_p9 }
  0x8a   :  { %2767 = shalt.err (!%p2764_p13)
}
  0x8b   :  { %47 = dma.hbm_to_vmem [thread:$0]  %s3682_s3, 1024, %s42_s23, [#allocation7], %s2940_s28, %s2940_s28, %s2941_s29  }
  0x8c   :  { %s2768_s12 = scalar_lea.hbm %s3656_s5, 2048 }
  0x8d   :  { %p2769_p0 = scmp.ne.s32.totalorder %s3656_s5, %s2768_s12  ;;  %p2772_p1 = scmp.lt.u32.totalorder %s2768_s12, %s3656_s5 }
  0x8f   :  { %p2774_p2 = pnand %p2772_p1, %p2769_p0 }
  0x91   :  { %2777 = shalt.err (!%p2774_p2)
}
  0x92   :  { %s2778_s25 = scalar_lea.vmem %s3158_s10, 2048  ;;  %p2783_p4 = scmp.lt.s32.totalorder %s3158_s10, %s3158_s10 }
  0x93   :  { %p2779_p3 = scmp.ne.s32.totalorder %s3158_s10, %s2778_s25  ;;  %p2784_p5 = scmp.lt.s32.totalorder %s2778_s25, %s2778_s25 }
  0x95   :  { %p2785_p6 = por %p2784_p5, %p2783_p4 }
  0x97   :  { %p2786_p7 = pnand %p2785_p6, %p2779_p3 }
  0x99   :  { %2789 = shalt.err (!%p2786_p7)
}
  0x9a   :  { %73 = dma.hbm_to_vmem [thread:$0]  %s3656_s5, 2048, %s3158_s10, [#allocation10], %s2940_s28, %s2940_s28, %s2941_s29  }
  0x9b   :  { %s2948_s8 = smov [#allocation14]   ;;  %s2949_s26 = smov [#allocation17]  }
  0x9c   :  { %s91_s20 = sshll.u32 %s2948_s8, 4  ;;  %s115_s6 = sshll.u32 %s2949_s26, 4  ;;  %s92_s20 = int_to_ptr.vmem [resolvable:$true] %s91_s20  ;;  %s3195_s6 = int_to_ptr.vmem [resolvable:$true] %s115_s6 }
  0x9d   :  { %s2790_s21 = scalar_lea.hbm %s3658_s7, 2048 }
  0x9e   :  { %p2791_p8 = scmp.ne.s32.totalorder %s3658_s7, %s2790_s21  ;;  %p2794_p9 = scmp.lt.u32.totalorder %s2790_s21, %s3658_s7 }
  0xa0   :  { %p2796_p10 = pnand %p2794_p9, %p2791_p8 }
  0xa2   :  { %2799 = shalt.err (!%p2796_p10)
}
  0xa3   :  { %s2800_s5 = scalar_lea.vmem %s92_s20, 2048  ;;  %p2805_p12 = scmp.lt.s32.totalorder %s92_s20, %s92_s20 }
  0xa4   :  { %p2801_p11 = scmp.ne.s32.totalorder %s92_s20, %s2800_s5  ;;  %p2806_p13 = scmp.lt.s32.totalorder %s2800_s5, %s2800_s5 }
  0xa6   :  { %p2807_p0 = por %p2806_p13, %p2805_p12 }
  0xa8   :  { %p2808_p1 = pnand %p2807_p0, %p2801_p11 }
  0xaa   :  { %2811 = shalt.err (!%p2808_p1)
}
  0xab   :  { %97 = dma.hbm_to_vmem [thread:$0]  %s3658_s7, 2048, %s92_s20, [#allocation13], %s2940_s28, %s2940_s28, %s2941_s29  }
  0xac   :  { %s2812_s22 = scalar_lea.hbm %s3660_s9, 2048 }
  0xad   :  { %p2813_p2 = scmp.ne.s32.totalorder %s3660_s9, %s2812_s22  ;;  %p2816_p3 = scmp.lt.u32.totalorder %s2812_s22, %s3660_s9 }
  0xaf   :  { %p2818_p4 = pnand %p2816_p3, %p2813_p2 }
  0xb1   :  { %2821 = shalt.err (!%p2818_p4)
}
  0xb2   :  { %s2822_s26 = scalar_lea.vmem %s3195_s6, 2048  ;;  %p2827_p6 = scmp.lt.s32.totalorder %s3195_s6, %s3195_s6 }
  0xb3   :  { %p2823_p5 = scmp.ne.s32.totalorder %s3195_s6, %s2822_s26  ;;  %p2828_p7 = scmp.lt.s32.totalorder %s2822_s26, %s2822_s26 }
  0xb5   :  { %p2829_p8 = por %p2828_p7, %p2827_p6 }
  0xb7   :  { %p2830_p9 = pnand %p2829_p8, %p2823_p5 }
  0xb9   :  { %2833 = shalt.err (!%p2830_p9)
}
  0xba   :  { %121 = dma.hbm_to_vmem [thread:$0]  %s3660_s9, 2048, %s3195_s6, [#allocation16], %s2940_s28, %s2940_s28, %s2941_s29  }
  0xbb   :  { %s2950_s30 = smov [#allocation20]   ;;  %s2951_s21 = smov [#allocation23]  }
  0xbc   :  { %s139_s16 = sshll.u32 %s2950_s30, 4  ;;  %s168_s2 = sshll.u32 %s2951_s21, 4  ;;  %s140_s16 = int_to_ptr.vmem [resolvable:$true] %s139_s16  ;;  %s169_s2 = int_to_ptr.vmem [resolvable:$true] %s168_s2 }
  0xbd   :  { %s2834_s12 = scalar_lea.hbm %s3662_s11, 2048 }
  0xbe   :  { %p2835_p10 = scmp.ne.s32.totalorder %s3662_s11, %s2834_s12  ;;  %p2838_p11 = scmp.lt.u32.totalorder %s2834_s12, %s3662_s11 }
  0xc0   :  { %p2840_p12 = pnand %p2838_p11, %p2835_p10 }
  0xc2   :  { %2843 = shalt.err (!%p2840_p12)
}
  0xc3   :  { %s2844_s9 = scalar_lea.vmem %s140_s16, 2048  ;;  %p2849_p0 = scmp.lt.s32.totalorder %s140_s16, %s140_s16 }
  0xc4   :  { %p2845_p13 = scmp.ne.s32.totalorder %s140_s16, %s2844_s9  ;;  %p2850_p1 = scmp.lt.s32.totalorder %s2844_s9, %s2844_s9 }
  0xc6   :  { %p2851_p2 = por %p2850_p1, %p2849_p0 }
  0xc8   :  { %p2852_p3 = pnand %p2851_p2, %p2845_p13 }
  0xca   :  { %2855 = shalt.err (!%p2852_p3)
}
  0xcb   :  { %145 = dma.hbm_to_vmem [thread:$0]  %s3662_s11, 2048, %s140_s16, [#allocation19], %s2940_s28, %s2940_s28, %s2941_s29  }
  0xcc   :  { %s2856_s23 = scalar_lea.hbm %s3666_s15, 16 }
  0xcd   :  { %p2857_p4 = scmp.ne.s32.totalorder %s3666_s15, %s2856_s23  ;;  %p2860_p5 = scmp.lt.u32.totalorder %s2856_s23, %s3666_s15 }
  0xcf   :  { %p2862_p6 = pnand %p2860_p5, %p2857_p4 }
  0xd1   :  { %2865 = shalt.err (!%p2862_p6)
}
  0xd2   :  { %s2866_s20 = scalar_lea.vmem %s169_s2, 16  ;;  %s2870_s30 = scalar_lea.vmem %s169_s2, 32 }
  0xd3   :  { %p2867_p7 = scmp.ne.s32.totalorder %s169_s2, %s2866_s20  ;;  %p2871_p8 = scmp.lt.s32.totalorder %s169_s2, %s169_s2 }
  0xd4   :  { %p2872_p9 = scmp.lt.s32.totalorder %s2870_s30, %s2866_s20 }
  0xd6   :  { %p2873_p10 = por %p2872_p9, %p2871_p8 }
  0xd8   :  { %p2874_p11 = pnand %p2873_p10, %p2867_p7 }
  0xda   :  { %2877 = shalt.err (!%p2874_p11)
}
  0xdb   :  { %171 = dma.hbm_to_vmem [thread:$0]  %s3666_s15, 16, %s169_s2, [#allocation22]  }
  0xdc   :  { %s2952_s29 = smov [#allocation26]   ;;  %s2878_s19 = scalar_lea.hbm %s3669_s18, 16 }
  0xdd   :  { %s190_s16 = sshll.u32 %s2952_s29, 4  ;;  %p2879_p12 = scmp.ne.s32.totalorder %s3669_s18, %s2878_s19  ;;  %s191_s16 = int_to_ptr.vmem [resolvable:$true] %s190_s16 }
  0xde   :  { %p2882_p13 = scmp.lt.u32.totalorder %s2878_s19, %s3669_s18 }
  0xe0   :  { %p2884_p0 = pnand %p2882_p13, %p2879_p12 }
  0xe2   :  { %2887 = shalt.err (!%p2884_p0)
}
  0xe3   :  { %s2888_s1 = scalar_lea.vmem %s191_s16, 16  ;;  %s2892_s15 = scalar_lea.vmem %s191_s16, 32 }
  0xe4   :  { %p2889_p1 = scmp.ne.s32.totalorder %s191_s16, %s2888_s1  ;;  %p2893_p2 = scmp.lt.s32.totalorder %s191_s16, %s191_s16 }
  0xe5   :  { %p2894_p3 = scmp.lt.s32.totalorder %s2892_s15, %s2888_s1 }
  0xe7   :  { %p2895_p4 = por %p2894_p3, %p2893_p2 }
  0xe9   :  { %p2896_p5 = pnand %p2895_p4, %p2889_p1 }
  0xeb   :  { %2899 = shalt.err (!%p2896_p5)
}
  0xec   :  { %193 = dma.hbm_to_vmem [thread:$0]  %s3669_s18, 16, %s191_s16, [#allocation25]  }
  0xed   :  { %2922 = dma.done.wait [#allocation7], 1024  }
  0xee   :  { %2923 = vsyncadd [#allocation7], 4294966272 }
  0xef   :  { %2924 = dma.done.wait [#allocation10], 3072  }
  0xf0   :  { %2925 = vsyncadd [#allocation10], 4294964224 }
  0xf1   :  { %2926 = dma.done.wait [#allocation13], 4096  }
  0xf2   :  { %2927 = vsyncadd [#allocation13], 4294963200 }
  0xf3   :  { %2928 = dma.done.wait [#allocation16], 4096  }
  0xf4   :  { %2929 = vsyncadd [#allocation16], 4294963200 }
  0xf5   :  { %2930 = dma.done.wait [#allocation19], 4096  }
  0xf6   :  { %2931 = vsyncadd [#allocation19], 4294963200 }
  0xf7   :  { %2932 = dma.done.wait [#allocation22], 2064  }
  0xf8   :  { %2933 = vsyncadd [#allocation22], 4294965232 }
  0xf9   :  { %2934 = dma.done.wait [#allocation25], 32  }
  0xfa   :  { %2935 = vsyncadd [#allocation25], 4294967264  ;;  %vm233_vm0 = vcmask 517120   ;;  %v2953_v0 = vmov 0.0   ;;  %s3683_s24 = sld [smem:[#allocation37_spill]]  ;;  %s3684_s16 = sld [smem:[#allocation36_spill]] }
  0xfb   :  { %234 = vst.msk [vmem:[#allocation3] sm:$0x3] %vm233_vm0, %v2953_v0  ;;  %vm266_vm1 = vcmask 523264   ;;  %v375_v19 = vld [vmem:[#allocation6] sm:$0xff]  ;;  %v376_v25 = vld [vmem:[#allocation6 + $0x8] sm:$0xff]  ;;  %v377_v33 = vld [vmem:[#allocation6 + $0x10] sm:$0xff] }
  0xfc   :  { %v2297_v31 = vpack.c.bf16 %v376_v25, %v375_v19  ;;  %v378_v34 = vld [vmem:[#allocation6 + $0x18] sm:$0xff]  ;;  %v379_v35 = vld [vmem:[#allocation6 + $0x20] sm:$0xff]  ;;  %v380_v41 = vld [vmem:[#allocation6 + $0x28] sm:$0xff]  ;;  %vm2955_vm2 = vmmov 0  }
  0xfd   :  { %v2301_v37 = vpack.c.bf16 %v378_v34, %v377_v33  ;;  %v2305_v47 = vpack.c.bf16 %v380_v41, %v379_v35  ;;  %v381_v49 = vld [vmem:[#allocation6 + $0x30] sm:$0xff]  ;;  %v382_v50 = vld [vmem:[#allocation6 + $0x38] sm:$0xff]  ;;  %v489_v52 = vld [vmem:[#allocation9] sm:$0xff]  ;;  %1998 = vmatprep.mubr.msk.f32.mxu1 %vm2955_vm2, %v2953_v0 }
  0xfe   :  { %v2309_v51 = vpack.c.bf16 %v382_v50, %v381_v49  ;;  %v490_v53 = vld [vmem:[#allocation9 + $0x8] sm:$0xff]  ;;  %v491_v56 = vld [vmem:[#allocation9 + $0x10] sm:$0xff]  ;;  %v492_v57 = vld [vmem:[#allocation9 + $0x18] sm:$0xff] }
  0xff   :  { %v2313_v55 = vpack.c.bf16 %v490_v53, %v489_v52  ;;  %v2317_v58 = vpack.c.bf16 %v492_v57, %v491_v56  ;;  %v493_v59 = vld [vmem:[#allocation9 + $0x20] sm:$0xff]  ;;  %v494_v60 = vld [vmem:[#allocation9 + $0x28] sm:$0xff]  ;;  %v495_v62 = vld [vmem:[#allocation9 + $0x30] sm:$0xff] }
 0x100   :  { %v258_v1 = vld [vmem:[%s3683_s24] sm:$0xff]  ;;  %v259_v2 = vld [vmem:[%s3683_s24 + $0x8] sm:$0xff]  ;;  %v260_v3 = vld [vmem:[%s3683_s24 + $0x10] sm:$0xff]  ;;  %v2321_v61 = vpack.c.bf16 %v494_v60, %v493_v59 }
 0x101   :  { %v2281_v4 = vpack.c.bf16 %v259_v2, %v258_v1  ;;  %v261_v5 = vld [vmem:[%s3683_s24 + $0x18] sm:$0xff]  ;;  %v262_v7 = vld [vmem:[%s3683_s24 + $0x20] sm:$0xff]  ;;  %v263_v8 = vld [vmem:[%s3683_s24 + $0x28] sm:$0xff] }
 0x102   :  { %v2285_v6 = vpack.c.bf16 %v261_v5, %v260_v3  ;;  %v1652_v9 = vld [vmem:[%s3684_s16 + $0x2] sm:$0x3]  ;;  %v1653_v10 = vld [vmem:[%s3684_s16 + $0x6] sm:$0x3]  ;;  %v1654_v11 = vld [vmem:[%s3684_s16 + $0xa] sm:$0x3]  ;;  %v2289_v14 = vpack.c.bf16 %v263_v8, %v262_v7 }
 0x103   :  { %2282 = vmatprep.subr.bf16.mxu0 %v2281_v4  ;;  %237 = vst.msk [vmem:[#allocation3 + $0x2] sm:$0x3] %vm233_vm0, %v1652_v9  ;;  %240 = vst.msk [vmem:[#allocation3 + $0x4] sm:$0x3] %vm233_vm0, %v1653_v10  ;;  %v1655_v12 = vld [vmem:[%s3684_s16 + $0xe] sm:$0x3] }
 0x104   :  { %2284 = vmatpush3.bf16.msra.mxu0 %v2281_v4  ;;  %243 = vst.msk [vmem:[#allocation3 + $0x6] sm:$0x3] %vm233_vm0, %v1654_v11  ;;  %v1656_v13 = vld [vmem:[%s3684_s16 + $0x12] sm:$0x3]  ;;  %246 = vst.msk [vmem:[#allocation3 + $0x8] sm:$0x3] %vm233_vm0, %v1655_v12 }
 0x105   :  { %2286 = vmatprep.subr.bf16.mxu0 %v2285_v6  ;;  %249 = vst.msk [vmem:[#allocation3 + $0xa] sm:$0x3] %vm233_vm0, %v1656_v13  ;;  %v1657_v15 = vld [vmem:[%s3684_s16 + $0x16] sm:$0x3]  ;;  %v1658_v16 = vld [vmem:[%s3684_s16 + $0x1a] sm:$0x3] }
 0x106   :  { %v264_v17 = vld [vmem:[%s3683_s24 + $0x30] sm:$0xff]  ;;  %v265_v18 = vld [vmem:[%s3683_s24 + $0x38] sm:$0xff]  ;;  %252 = vst.msk [vmem:[#allocation3 + $0xc] sm:$0x3] %vm233_vm0, %v1657_v15  ;;  %255 = vst.msk [vmem:[#allocation3 + $0xe] sm:$0x3] %vm233_vm0, %v1658_v16 }
 0x107   :  { %v350_v20 = vld [vmem:[%s3684_s16] sm:$0x3]  ;;  %v2293_v21 = vpack.c.bf16 %v265_v18, %v264_v17  ;;  %v1661_v22 = vld [vmem:[%s3684_s16 + $0x4] sm:$0x3]  ;;  %v1662_v23 = vld [vmem:[%s3684_s16 + $0x8] sm:$0x3] }
 0x108   :  { %2288 = vmatpush3.bf16.msra.mxu0 %v2285_v6  ;;  %v1663_v24 = vld [vmem:[%s3684_s16 + $0xc] sm:$0x3]  ;;  %v1664_v26 = vld [vmem:[%s3684_s16 + $0x10] sm:$0x3]  ;;  %v1665_v27 = vld [vmem:[%s3684_s16 + $0x14] sm:$0x3] }
 0x109   :  { %2290 = vmatprep.subr.bf16.mxu0 %v2289_v14  ;;  %v1666_v29 = vld [vmem:[%s3684_s16 + $0x18] sm:$0x3]  ;;  %v1667_v30 = vld [vmem:[%s3684_s16 + $0x1c] sm:$0x3]  ;;  %v1670_v36 = vld [vmem:[%s3684_s16 + $0x2] sm:$0x3] }
 0x10a   :  { %v1671_v38 = vld [vmem:[%s3684_s16 + $0x6] sm:$0x3]  ;;  %v1672_v39 = vld [vmem:[%s3684_s16 + $0xa] sm:$0x3]  ;;  %v1673_v40 = vld [vmem:[%s3684_s16 + $0xe] sm:$0x3] }
 0x10b   :  { %v256_v28 = vld [vmem:[#allocation3] sm:$0xff]  ;;  %v1676_v45 = vld [vmem:[%s3684_s16 + $0x1a] sm:$0x3]  ;;  %v1677_v46 = vld [vmem:[%s3684_s16 + $0x1e] sm:$0x3]  ;;  %v2954_v6 = vmov 0.0|0.0  }
 0x10c   :  { %2292 = vmatpush3.bf16.msra.mxu0 %v2289_v14  ;;  %1925 = vmatprep.mubr.msk.f32.mxu0 %vm266_vm1, %v256_v28  ;;  %351 = vst.msk [vmem:[#allocation3] sm:$0x3] %vm233_vm0, %v350_v20  ;;  %354 = vst.msk [vmem:[#allocation3 + $0x2] sm:$0x3] %vm233_vm0, %v1661_v22  ;;  %v1674_v42 = vld [vmem:[%s3684_s16 + $0x12] sm:$0x3] }
 0x10d   :  { %357 = vst.msk [vmem:[#allocation3 + $0x4] sm:$0x3] %vm233_vm0, %v1662_v23  ;;  %360 = vst.msk [vmem:[#allocation3 + $0x6] sm:$0x3] %vm233_vm0, %v1663_v24  ;;  %2294 = vmatprep.subr.bf16.mxu0 %v2293_v21  ;;  %v257_v32 = vld [vmem:[#allocation3 + $0x8] sm:$0xff]  ;;  %v496_v63 = vld [vmem:[#allocation9 + $0x38] sm:$0xff]  ;;  %2329 = vmatprep.subr.bf16.mxu1 %v2954_v6 }
 0x10e   :  { %363 = vst.msk [vmem:[#allocation3 + $0x8] sm:$0x3] %vm233_vm0, %v1664_v26  ;;  %366 = vst.msk [vmem:[#allocation3 + $0xa] sm:$0x3] %vm233_vm0, %v1665_v27  ;;  %v1675_v43 = vld [vmem:[%s3684_s16 + $0x16] sm:$0x3]  ;;  %v2325_v1 = vpack.c.bf16 %v496_v63, %v495_v62 }
 0x10f   :  { %369 = vst.msk [vmem:[#allocation3 + $0xc] sm:$0x3] %vm233_vm0, %v1666_v29  ;;  %372 = vst.msk [vmem:[#allocation3 + $0xe] sm:$0x3] %vm233_vm0, %v1667_v30  ;;  %v617_v3 = vld [vmem:[%s3655_s4] sm:$0xff]  ;;  %v618_v4 = vld [vmem:[%s3655_s4 + $0x8] sm:$0xff] }
 0x110   :  { %2296 = vmatpush3.bf16.msra.mxu0 %v2293_v21  ;;  %v2330_v5 = vpack.c.bf16 %v618_v4, %v617_v3  ;;  %v619_v7 = vld [vmem:[%s3655_s4 + $0x10] sm:$0xff]  ;;  %v620_v8 = vld [vmem:[%s3655_s4 + $0x18] sm:$0xff]  ;;  %v621_v10 = vld [vmem:[%s3655_s4 + $0x20] sm:$0xff] }
 0x111   :  { %2298 = vmatprep.subr.bf16.mxu0 %v2297_v31  ;;  %v2333_v9 = vpack.c.bf16 %v620_v8, %v619_v7  ;;  %v622_v11 = vld [vmem:[%s3655_s4 + $0x28] sm:$0xff]  ;;  %v623_v13 = vld [vmem:[%s3655_s4 + $0x30] sm:$0xff]  ;;  %v624_v14 = vld [vmem:[%s3655_s4 + $0x38] sm:$0xff] }
 0x112   :  { %2331 = vmatpush3.bf16.msra.mxu1 %v2330_v5  ;;  %v2336_v12 = vpack.c.bf16 %v622_v11, %v621_v10  ;;  %v2339_v15 = vpack.c.bf16 %v624_v14, %v623_v13  ;;  %v625_v16 = vld [vmem:[%s3655_s4 + $0x40] sm:$0xff]  ;;  %v626_v17 = vld [vmem:[%s3655_s4 + $0x48] sm:$0xff]  ;;  %v627_v19 = vld [vmem:[%s3655_s4 + $0x50] sm:$0xff] }
 0x113   :  { %1926 = vmatmul.mubr.msk.f32.vlgmr.msra.gmra.mrb[0].mxu0 %vm266_vm1, %v257_v32  ;;  %2332 = vmatprep.subr.bf16.mxu1 %v2954_v6  ;;  %v2342_v18 = vpack.c.bf16 %v626_v17, %v625_v16  ;;  %v628_v20 = vld [vmem:[%s3655_s4 + $0x58] sm:$0xff]  ;;  %v629_v22 = vld [vmem:[%s3655_s4 + $0x60] sm:$0xff]  ;;  %v630_v23 = vld [vmem:[%s3655_s4 + $0x68] sm:$0xff] }
 0x114   :  { %v373_v44 = vld [vmem:[#allocation3] sm:$0xff]  ;;  %2300 = vmatpush3.bf16.msra.mxu0 %v2297_v31  ;;  %v2345_v21 = vpack.c.bf16 %v628_v20, %v627_v19  ;;  %v2348_v24 = vpack.c.bf16 %v630_v23, %v629_v22  ;;  %v632_v26 = vld [vmem:[%s3655_s4 + $0x78] sm:$0xff]  ;;  %v1680_v28 = vld [vmem:[%s3664_s13] ss:$0 sm:$0xff] }
 0x115   :  { %1944 = vmatprep.mubr.msk.f32.mxu0 %vm266_vm1, %v373_v44  ;;  %471 = vst.msk [vmem:[#allocation3] sm:$0x3] %vm233_vm0, %v1670_v36  ;;  %473 = vst.msk [vmem:[#allocation3 + $0x2] sm:$0x3] %vm233_vm0, %v1671_v38  ;;  %2302 = vmatprep.subr.bf16.mxu0 %v2301_v37  ;;  %v631_v25 = vld [vmem:[%s3655_s4 + $0x70] sm:$0xff]  ;;  %v715_v49 = vld [vmem:[#allocation11 + $0x10] sm:$0xff] }
 0x116   :  { %475 = vst.msk [vmem:[#allocation3 + $0x4] sm:$0x3] %vm233_vm0, %v1672_v39  ;;  %477 = vst.msk [vmem:[#allocation3 + $0x6] sm:$0x3] %vm233_vm0, %v1673_v40  ;;  %v374_v48 = vld [vmem:[#allocation3 + $0x8] sm:$0xff]  ;;  %2334 = vmatpush3.bf16.msra.mxu1 %v2333_v9  ;;  %v2351_v27 = vpack.c.bf16 %v632_v26, %v631_v25  ;;  %v716_v52 = vld [vmem:[#allocation11 + $0x18] sm:$0xff] }
 0x117   :  { %479 = vst.msk [vmem:[#allocation3 + $0x8] sm:$0x3] %vm233_vm0, %v1674_v42  ;;  %481 = vst.msk [vmem:[#allocation3 + $0xa] sm:$0x3] %vm233_vm0, %v1675_v43  ;;  %2335 = vmatprep.subr.bf16.mxu1 %v2954_v6  ;;  %v2357_v56 = vpack.c.bf16 %v716_v52, %v715_v49  ;;  %v717_v57 = vld [vmem:[#allocation11 + $0x20] sm:$0xff]  ;;  %v719_v60 = vld [vmem:[#allocation11 + $0x30] sm:$0xff] }
 0x118   :  { %483 = vst.msk [vmem:[#allocation3 + $0xc] sm:$0x3] %vm233_vm0, %v1676_v45  ;;  %486 = vst.msk [vmem:[#allocation3 + $0xe] sm:$0x3] %vm233_vm0, %v1677_v46  ;;  %2304 = vmatpush3.bf16.msra.mxu0 %v2301_v37  ;;  %v713_v46 = vld [vmem:[#allocation11] sm:$0xff]  ;;  %v720_v63 = vld [vmem:[#allocation11 + $0x38] sm:$0xff] }
 0x119   :  { %2306 = vmatprep.subr.bf16.mxu0 %v2305_v47  ;;  %v2363_v4 = vpack.c.bf16 %v720_v63, %v719_v60  ;;  %v721_v5 = vld [vmem:[#allocation11 + $0x40] sm:$0xff]  ;;  %v722_v7 = vld [vmem:[#allocation11 + $0x48] sm:$0xff]  ;;  %v723_v9 = vld [vmem:[#allocation11 + $0x50] sm:$0xff] }
 0x11a   :  { %2337 = vmatpush3.bf16.msra.mxu1 %v2336_v12  ;;  %v2366_v8 = vpack.c.bf16 %v722_v7, %v721_v5  ;;  %v724_v10 = vld [vmem:[#allocation11 + $0x58] sm:$0xff]  ;;  %v725_v13 = vld [vmem:[#allocation11 + $0x60] sm:$0xff]  ;;  %v726_v14 = vld [vmem:[#allocation11 + $0x68] sm:$0xff] }
 0x11b   :  { %2338 = vmatprep.subr.bf16.mxu1 %v2954_v6  ;;  %v2369_v12 = vpack.c.bf16 %v724_v10, %v723_v9  ;;  %v727_v16 = vld [vmem:[#allocation11 + $0x70] sm:$0xff]  ;;  %v728_v17 = vld [vmem:[#allocation11 + $0x78] sm:$0xff]  ;;  %v811_v19 = vld [vmem:[#allocation12] sm:$0xff] }
 0x11c   :  { %2308 = vmatpush3.bf16.msra.mxu0 %v2305_v47  ;;  %v714_v47 = vld [vmem:[#allocation11 + $0x8] sm:$0xff]  ;;  %v813_v22 = vld [vmem:[#allocation12 + $0x10] sm:$0xff]  ;;  %v814_v23 = vld [vmem:[#allocation12 + $0x18] sm:$0xff] }
 0x11d   :  { %v487_v54 = vld [vmem:[#allocation3] sm:$0xff]  ;;  %2310 = vmatprep.subr.bf16.mxu0 %v2309_v51  ;;  %v812_v20 = vld [vmem:[#allocation12 + $0x8] sm:$0xff]  ;;  %v926_v52 = vld [vmem:[#allocation14 + $0x30] sm:$0xff] }
 0x11e   :  { %609 = vst [vmem:[#allocation3] sm:$0x3] %v2953_v0  ;;  %2340 = vmatpush3.bf16.msra.mxu1 %v2339_v15  ;;  %v2372_v15 = vpack.c.bf16 %v726_v14, %v725_v13  ;;  %v815_v25 = vld [vmem:[#allocation12 + $0x20] sm:$0xff]  ;;  %v816_v26 = vld [vmem:[#allocation12 + $0x28] sm:$0xff]  ;;  %v1108_v63 = vld [vmem:[#allocation17 + $0x10] sm:$0xff] }
 0x11f   :  { %v488_v2 = vld [vmem:[#allocation3 + $0x8] sm:$0xff]  ;;  %2341 = vmatprep.subr.bf16.mxu1 %v2954_v6  ;;  %v1112_v13 = vld [vmem:[#allocation17 + $0x30] sm:$0xff]  ;;  %v1113_v14 = vld [vmem:[#allocation17 + $0x38] sm:$0xff] }
 0x120   :  { %2312 = vmatpush3.bf16.msra.mxu0 %v2309_v51  ;;  %v924_v49 = vld [vmem:[#allocation14 + $0x20] sm:$0xff] }
 0x121   :  { %2314 = vmatprep.subr.bf16.mxu0 %v2313_v55  ;;  %v1110_v7 = vld [vmem:[#allocation17 + $0x20] sm:$0xff] }
 0x122   :  { %2343 = vmatpush3.bf16.msra.mxu1 %v2342_v18  ;;  %v2375_v18 = vpack.c.bf16 %v728_v17, %v727_v16  ;;  %v2459_v16 = vpack.c.bf16 %v1113_v14, %v1112_v13  ;;  %v1114_v17 = vld [vmem:[#allocation17 + $0x40] sm:$0xff] }
 0x123   :  { %1945 = vmatmul.mubr.msk.f32.vlgmr.msra.gmra.mrb[0].mxu0 %vm266_vm1, %v374_v48  ;;  %2344 = vmatprep.subr.bf16.mxu1 %v2954_v6  ;;  %v2354_v48 = vpack.c.bf16 %v714_v47, %v713_v46  ;;  %v922_v46 = vld [vmem:[#allocation14 + $0x10] sm:$0xff]  ;;  %v923_v47 = vld [vmem:[#allocation14 + $0x18] sm:$0xff]  ;;  %v1219_v14 = vld [vmem:[#allocation18 + $0x20] sm:$0xff] }
 0x124   :  { %2316 = vmatpush3.bf16.msra.mxu0 %v2313_v55  ;;  %1963 = vmatprep.mubr.msk.f32.mxu0 %vm266_vm1, %v487_v54 }
 0x125   :  { %2318 = vmatprep.subr.bf16.mxu0 %v2317_v58 }
 0x126   :  { %2346 = vmatpush3.bf16.msra.mxu1 %v2345_v21  ;;  %v2378_v21 = vpack.c.bf16 %v812_v20, %v811_v19  ;;  %v1116_v20 = vld [vmem:[#allocation17 + $0x50] sm:$0xff] }
 0x127   :  { %2347 = vmatprep.subr.bf16.mxu1 %v2954_v6 }
 0x128   :  { %2320 = vmatpush3.bf16.msra.mxu0 %v2317_v58  ;;  %v718_v58 = vld [vmem:[#allocation11 + $0x28] sm:$0xff] }
 0x129   :  { %2322 = vmatprep.subr.bf16.mxu0 %v2321_v61  ;;  %v2360_v59 = vpack.c.bf16 %v718_v58, %v717_v57  ;;  %v1106_v58 = vld [vmem:[#allocation17] sm:$0xff] }
 0x12a   :  { %2349 = vmatpush3.bf16.msra.mxu1 %v2348_v24  ;;  %v2381_v24 = vpack.c.bf16 %v814_v23, %v813_v22  ;;  %v1118_v23 = vld [vmem:[#allocation17 + $0x60] sm:$0xff] }
 0x12b   :  { %2350 = vmatprep.subr.bf16.mxu1 %v2954_v6 }
 0x12c   :  { %2324 = vmatpush3.bf16.msra.mxu0 %v2321_v61 }
 0x12d   :  { %2326 = vmatprep.subr.bf16.mxu0 %v2325_v1 }
 0x12e   :  { %2352 = vmatpush3.bf16.msra.mxu1 %v2351_v27  ;;  %v2384_v27 = vpack.c.bf16 %v816_v26, %v815_v25  ;;  %v1120_v26 = vld [vmem:[#allocation17 + $0x70] sm:$0xff] }
 0x12f   :  { %2353 = vmatprep.subr.bf16.mxu1 %v2954_v6 }
 0x130   :  { %2328 = vmatpush3.bf16.msra.mxu0 %v2325_v1 }
 0x131   :  { %2401 = vmatprep.subr.bf16.mxu0 %v2954_v6 }
 0x133   :  { %1964 = vmatmul.mubr.msk.f32.vlgmr.msra.gmra.mrb[0].mxu0 %vm266_vm1, %v488_v2 }
 0x134   :  { %2103 = vmatprep.mubr.msk.f32.mxu0 %vm2955_vm2, %v2953_v0 }
 0x206   :  { %v1965_v29 = vpop.f32.mrb[0].mxu0 }
 0x207   :  { %v594_v30 = vadd.f32 %v1965_v29, %v1680_v28  ;;  %v569_v31 = vpop.f32.mrb[1].mxu0  ;;  %v818_v29 = vld [vmem:[#allocation12 + $0x38] sm:$0xff] }
 0x208   :  { %v593_v32 = vadd.f32 %v1680_v28, %v569_v31  ;;  %v817_v28 = vld [vmem:[#allocation12 + $0x30] sm:$0xff]  ;;  %v819_v31 = vld [vmem:[#allocation12 + $0x40] sm:$0xff] }
 0x209   :  { %v598_v33 = vmin.f32 %v594_v30, 0.0  ;;  %vm596_vm3 = vcmp.gt.f32.partialorder %v594_v30, 0.0 }
 0x20a   :  { %v597_v34 = vmin.f32 %v593_v32, 0.0  ;;  %vm595_vm4 = vcmp.gt.f32.partialorder %v593_v32, 0.0 }
 0x20b   :  { %v601_v35 = vmul.f32 1.442695, %v598_v33 }
 0x20c   :  { %v599_v36 = vmul.f32 1.442695, %v597_v34  ;;  %v821_v34 = vld [vmem:[#allocation12 + $0x50] sm:$0xff] }
 0x20d   :  { %2604 = vpow2.f32 %v601_v35  ;;  %v822_v35 = vld [vmem:[#allocation12 + $0x58] sm:$0xff] }
 0x20e   :  { %2606 = vpow2.f32 %v599_v36  ;;  %v2393_v36 = vpack.c.bf16 %v822_v35, %v821_v34 }
 0x217   :  { %v2605_v37 = vpop.eup %2604 }
 0x218   :  { %v2607_v38 = vpop.eup %2606  ;;  %v1682_v39 = vadd.f32 -1.0, %v2605_v37  ;;  %v823_v37 = vld [vmem:[#allocation12 + $0x60] sm:$0xff] }
 0x219   :  { %v1681_v40 = vadd.f32 -1.0, %v2607_v38  ;;  %v824_v38 = vld [vmem:[#allocation12 + $0x68] sm:$0xff] }
 0x21a   :  { %v606_v41 = vsel %vm596_vm3, %v594_v30, %v1682_v39  ;;  %v2387_v30 = vpack.c.bf16 %v818_v29, %v817_v28  ;;  %v2396_v39 = vpack.c.bf16 %v824_v38, %v823_v37  ;;  %v1683_v29 = vld [vmem:[%s3665_s14] ss:$0 sm:$0xff] }
 0x21b   :  { %608 = vst [vmem:[#allocation2 + $0x8] sm:$0xff] %v606_v41  ;;  %v605_v42 = vsel %vm595_vm4, %v593_v32, %v1681_v40  ;;  %v820_v32 = vld [vmem:[#allocation12 + $0x48] sm:$0xff]  ;;  %v825_v40 = vld [vmem:[#allocation12 + $0x70] sm:$0xff]  ;;  %v826_v41 = vld [vmem:[#allocation12 + $0x78] sm:$0xff] }
 0x21c   :  { %607 = vst [vmem:[#allocation2] sm:$0xff] %v605_v42  ;;  %v2390_v33 = vpack.c.bf16 %v820_v32, %v819_v31  ;;  %v2399_v42 = vpack.c.bf16 %v826_v41, %v825_v40  ;;  %v1013_v40 = vld [vmem:[#allocation15 + $0x8] sm:$0xff] }
 0x222   :  { %v614_v43 = vld [vmem:[#allocation2 + $0xa] sm:$0x3]  ;;  %v708_v50 = vld [vmem:[#allocation2 + $0x8] sm:$0x3]  ;;  %v710_v51 = vld [vmem:[#allocation2 + $0xc] sm:$0x3] }
 0x223   :  { %615 = vst [vmem:[#allocation3 + $0x6] sm:$0x3] %v614_v43  ;;  %v610_v44 = vld [vmem:[#allocation2 + $0x2] sm:$0x3]  ;;  %v612_v45 = vld [vmem:[#allocation2 + $0x6] sm:$0x3] }
 0x224   :  { %611 = vst [vmem:[#allocation3 + $0x2] sm:$0x3] %v610_v44  ;;  %613 = vst [vmem:[#allocation3 + $0x4] sm:$0x3] %v612_v45  ;;  %v704_v54 = vld [vmem:[#allocation2] sm:$0x3] }
 0x225   :  { %v706_v55 = vld [vmem:[#allocation2 + $0x4] sm:$0x3]  ;;  %v806_v61 = vld [vmem:[#allocation2 + $0xa] sm:$0x3]  ;;  %v808_v62 = vld [vmem:[#allocation2 + $0xe] sm:$0x3] }
 0x226   :  { %v802_v1 = vld [vmem:[#allocation2 + $0x2] sm:$0x3]  ;;  %v804_v2 = vld [vmem:[#allocation2 + $0x6] sm:$0x3]  ;;  %v920_v43 = vld [vmem:[#allocation14] sm:$0xff] }
 0x227   :  { %v921_v44 = vld [vmem:[#allocation14 + $0x8] sm:$0xff] }
 0x228   :  { %v2402_v45 = vpack.c.bf16 %v921_v44, %v920_v43  ;;  %v1015_v43 = vld [vmem:[#allocation15 + $0x18] sm:$0xff] }
 0x22a   :  { %2403 = vmatpush3.bf16.msra.mxu0 %v2402_v45 }
 0x22b   :  { %v616_v53 = vld [vmem:[#allocation3] sm:$0xff]  ;;  %2404 = vmatprep.subr.bf16.mxu0 %v2954_v6 }
 0x22c   :  { %705 = vst [vmem:[#allocation3] sm:$0x3] %v704_v54  ;;  %707 = vst [vmem:[#allocation3 + $0x2] sm:$0x3] %v706_v55  ;;  %1999 = vmatmul.mubr.f32.vlgmr.msra.gmra.mrb[0].mxu1 %v616_v53  ;;  %v927_v53 = vld [vmem:[#allocation14 + $0x38] sm:$0xff]  ;;  %v928_v55 = vld [vmem:[#allocation14 + $0x40] sm:$0xff] }
 0x22d   :  { %709 = vst [vmem:[#allocation3 + $0x4] sm:$0x3] %v708_v50  ;;  %711 = vst [vmem:[#allocation3 + $0x6] sm:$0x3] %v710_v51  ;;  %2355 = vmatpush3.bf16.msra.mxu1 %v2354_v48  ;;  %2033 = vmatprep.mubr.msk.f32.mxu1 %vm2955_vm2, %v2953_v0  ;;  %v2405_v48 = vpack.c.bf16 %v923_v47, %v922_v46  ;;  %v925_v50 = vld [vmem:[#allocation14 + $0x28] sm:$0xff]  ;;  %v2411_v54 = vpack.c.bf16 %v927_v53, %v926_v52  ;;  %v1019_v52 = vld [vmem:[#allocation15 + $0x38] sm:$0xff] }
 0x22e   :  { %2356 = vmatprep.subr.bf16.mxu1 %v2954_v6  ;;  %v2408_v51 = vpack.c.bf16 %v925_v50, %v924_v49  ;;  %v1017_v49 = vld [vmem:[#allocation15 + $0x28] sm:$0xff] }
 0x22f   :  { %2406 = vmatpush3.bf16.msra.mxu0 %v2405_v48  ;;  %v1016_v48 = vld [vmem:[#allocation15 + $0x20] sm:$0xff] }
 0x230   :  { %2407 = vmatprep.subr.bf16.mxu0 %v2954_v6  ;;  %v2432_v50 = vpack.c.bf16 %v1017_v49, %v1016_v48 }
 0x231   :  { %2358 = vmatpush3.bf16.msra.mxu1 %v2357_v56  ;;  %v929_v56 = vld [vmem:[#allocation14 + $0x48] sm:$0xff] }
 0x232   :  { %2359 = vmatprep.subr.bf16.mxu1 %v2954_v6  ;;  %v2414_v57 = vpack.c.bf16 %v929_v56, %v928_v55 }
 0x233   :  { %2409 = vmatpush3.bf16.msra.mxu0 %v2408_v51  ;;  %v1018_v51 = vld [vmem:[#allocation15 + $0x30] sm:$0xff] }
 0x234   :  { %v712_v3 = vld [vmem:[#allocation3] sm:$0xff]  ;;  %2410 = vmatprep.subr.bf16.mxu0 %v2954_v6  ;;  %v2435_v56 = vpack.c.bf16 %v1019_v52, %v1018_v51  ;;  %v1320_v51 = vld [vmem:[#allocation20 + $0x68] sm:$0xff] }
 0x235   :  { %803 = vst [vmem:[#allocation3] sm:$0x3] %v802_v1  ;;  %805 = vst [vmem:[#allocation3 + $0x2] sm:$0x3] %v804_v2  ;;  %2361 = vmatpush3.bf16.msra.mxu1 %v2360_v59  ;;  %v1107_v59 = vld [vmem:[#allocation17 + $0x8] sm:$0xff]  ;;  %v1109_v2 = vld [vmem:[#allocation17 + $0x18] sm:$0xff] }
 0x236   :  { %807 = vst [vmem:[#allocation3 + $0x4] sm:$0x3] %v806_v61  ;;  %809 = vst [vmem:[#allocation3 + $0x6] sm:$0x3] %v808_v62  ;;  %2362 = vmatprep.subr.bf16.mxu1 %v2954_v6  ;;  %v2450_v60 = vpack.c.bf16 %v1107_v59, %v1106_v58  ;;  %v930_v61 = vld [vmem:[#allocation14 + $0x50] sm:$0xff]  ;;  %v931_v62 = vld [vmem:[#allocation14 + $0x58] sm:$0xff]  ;;  %v2453_v5 = vpack.c.bf16 %v1109_v2, %v1108_v63 }
 0x237   :  { %2412 = vmatpush3.bf16.msra.mxu0 %v2411_v54  ;;  %v2417_v1 = vpack.c.bf16 %v931_v62, %v930_v61  ;;  %v1021_v58 = vld [vmem:[#allocation15 + $0x48] sm:$0xff]  ;;  %v1023_v61 = vld [vmem:[#allocation15 + $0x58] sm:$0xff] }
 0x238   :  { %2413 = vmatprep.subr.bf16.mxu0 %v2954_v6  ;;  %v1025_v2 = vld [vmem:[#allocation15 + $0x68] sm:$0xff] }
 0x239   :  { %2364 = vmatpush3.bf16.msra.mxu1 %v2363_v4  ;;  %v933_v4 = vld [vmem:[#allocation14 + $0x68] sm:$0xff] }
 0x23a   :  { %2365 = vmatprep.subr.bf16.mxu1 %v2954_v6 }
 0x23b   :  { %2415 = vmatpush3.bf16.msra.mxu0 %v2414_v57  ;;  %v1020_v57 = vld [vmem:[#allocation15 + $0x40] sm:$0xff] }
 0x23c   :  { %2416 = vmatprep.subr.bf16.mxu0 %v2954_v6  ;;  %v2438_v59 = vpack.c.bf16 %v1021_v58, %v1020_v57 }
 0x23d   :  { %v810_v11 = vld [vmem:[#allocation3] sm:$0xff]  ;;  %2367 = vmatpush3.bf16.msra.mxu1 %v2366_v8  ;;  %v1111_v8 = vld [vmem:[#allocation17 + $0x28] sm:$0xff] }
 0x23e   :  { %916 = vst [vmem:[#allocation3] sm:$0x3] %v2953_v0  ;;  %2368 = vmatprep.subr.bf16.mxu1 %v2954_v6  ;;  %v2456_v10 = vpack.c.bf16 %v1111_v8, %v1110_v7  ;;  %v1215_v8 = vld [vmem:[#allocation18] sm:$0xff] }
 0x23f   :  { %2418 = vmatpush3.bf16.msra.mxu0 %v2417_v1  ;;  %v1024_v1 = vld [vmem:[#allocation15 + $0x60] sm:$0xff] }
 0x240   :  { %2419 = vmatprep.subr.bf16.mxu0 %v2954_v6 }
 0x241   :  { %2370 = vmatpush3.bf16.msra.mxu1 %v2369_v12  ;;  %v935_v12 = vld [vmem:[#allocation14 + $0x78] sm:$0xff] }
 0x242   :  { %2371 = vmatprep.subr.bf16.mxu1 %v2954_v6 }
 0x245   :  { %2373 = vmatpush3.bf16.msra.mxu1 %v2372_v15 }
 0x246   :  { %2374 = vmatprep.subr.bf16.mxu1 %v2954_v6 }
 0x249   :  { %2376 = vmatpush3.bf16.msra.mxu1 %v2375_v18  ;;  %v1115_v18 = vld [vmem:[#allocation17 + $0x48] sm:$0xff] }
 0x24a   :  { %2377 = vmatprep.subr.bf16.mxu1 %v2954_v6  ;;  %v2462_v19 = vpack.c.bf16 %v1115_v18, %v1114_v17  ;;  %v1307_v17 = vld [vmem:[#allocation20] sm:$0xff]  ;;  %v1308_v18 = vld [vmem:[#allocation20 + $0x8] sm:$0xff] }
 0x24c   :  { %2034 = vmatmul.mubr.f32.vlgmr.msra.gmra.mrb[0].mxu1 %v712_v3  ;;  %v932_v3 = vld [vmem:[#allocation14 + $0x60] sm:$0xff] }
 0x24d   :  { %2379 = vmatpush3.bf16.msra.mxu1 %v2378_v21  ;;  %2068 = vmatprep.mubr.msk.f32.mxu1 %vm2955_vm2, %v2953_v0  ;;  %v2420_v9 = vpack.c.bf16 %v933_v4, %v932_v3  ;;  %v1117_v21 = vld [vmem:[#allocation17 + $0x58] sm:$0xff]  ;;  %v2444_v3 = vpack.c.bf16 %v1025_v2, %v1024_v1  ;;  %v1026_v4 = vld [vmem:[#allocation15 + $0x70] sm:$0xff] }
 0x24e   :  { %2380 = vmatprep.subr.bf16.mxu1 %v2954_v6  ;;  %v2465_v22 = vpack.c.bf16 %v1117_v21, %v1116_v20  ;;  %v1221_v20 = vld [vmem:[#allocation18 + $0x30] sm:$0xff]  ;;  %v1222_v21 = vld [vmem:[#allocation18 + $0x38] sm:$0xff] }
 0x24f   :  { %2421 = vmatpush3.bf16.msra.mxu0 %v2420_v9  ;;  %v1216_v9 = vld [vmem:[#allocation18 + $0x8] sm:$0xff] }
 0x250   :  { %2422 = vmatprep.subr.bf16.mxu0 %v2954_v6 }
 0x251   :  { %2382 = vmatpush3.bf16.msra.mxu1 %v2381_v24  ;;  %v1119_v24 = vld [vmem:[#allocation17 + $0x68] sm:$0xff] }
 0x252   :  { %2383 = vmatprep.subr.bf16.mxu1 %v2954_v6  ;;  %v2468_v25 = vpack.c.bf16 %v1119_v24, %v1118_v23  ;;  %v1309_v23 = vld [vmem:[#allocation20 + $0x10] sm:$0xff]  ;;  %v1310_v24 = vld [vmem:[#allocation20 + $0x18] sm:$0xff] }
 0x255   :  { %2385 = vmatpush3.bf16.msra.mxu1 %v2384_v27  ;;  %v1121_v27 = vld [vmem:[#allocation17 + $0x78] sm:$0xff] }
 0x256   :  { %2386 = vmatprep.subr.bf16.mxu1 %v2954_v6  ;;  %v2471_v28 = vpack.c.bf16 %v1121_v27, %v1120_v26  ;;  %v1223_v26 = vld [vmem:[#allocation18 + $0x40] sm:$0xff]  ;;  %v1224_v27 = vld [vmem:[#allocation18 + $0x48] sm:$0xff] }
 0x259   :  { %2388 = vmatpush3.bf16.msra.mxu1 %v2387_v30 }
 0x25a   :  { %2389 = vmatprep.subr.bf16.mxu1 %v2954_v6 }
 0x25d   :  { %2391 = vmatpush3.bf16.msra.mxu1 %v2390_v33 }
 0x25e   :  { %2392 = vmatprep.subr.bf16.mxu1 %v2954_v6 }
 0x261   :  { %2394 = vmatpush3.bf16.msra.mxu1 %v2393_v36 }
 0x262   :  { %2395 = vmatprep.subr.bf16.mxu1 %v2954_v6 }
 0x265   :  { %2397 = vmatpush3.bf16.msra.mxu1 %v2396_v39  ;;  %v1012_v39 = vld [vmem:[#allocation15] sm:$0xff] }
 0x266   :  { %2398 = vmatprep.subr.bf16.mxu1 %v2954_v6  ;;  %v2426_v41 = vpack.c.bf16 %v1013_v40, %v1012_v39  ;;  %v1315_v40 = vld [vmem:[#allocation20 + $0x40] sm:$0xff] }
 0x269   :  { %2400 = vmatpush3.bf16.msra.mxu1 %v2399_v42  ;;  %v1014_v42 = vld [vmem:[#allocation15 + $0x10] sm:$0xff] }
 0x26a   :  { %2449 = vmatprep.subr.bf16.mxu1 %v2954_v6  ;;  %v2429_v47 = vpack.c.bf16 %v1015_v43, %v1014_v42 }
 0x26c   :  { %2069 = vmatmul.mubr.f32.vlgmr.msra.gmra.mrb[0].mxu1 %v810_v11  ;;  %v934_v11 = vld [vmem:[#allocation14 + $0x70] sm:$0xff] }
 0x26d   :  { %2173 = vmatprep.mubr.msk.f32.mxu1 %vm2955_vm2, %v2953_v0  ;;  %2451 = vmatpush3.bf16.msra.mxu1 %v2450_v60  ;;  %v2423_v15 = vpack.c.bf16 %v935_v12, %v934_v11  ;;  %v1022_v60 = vld [vmem:[#allocation15 + $0x50] sm:$0xff]  ;;  %v1218_v12 = vld [vmem:[#allocation18 + $0x18] sm:$0xff] }
 0x26e   :  { %2452 = vmatprep.subr.bf16.mxu1 %v2954_v6  ;;  %v2441_v63 = vpack.c.bf16 %v1023_v61, %v1022_v60  ;;  %v1217_v11 = vld [vmem:[#allocation18 + $0x10] sm:$0xff] }
 0x26f   :  { %2424 = vmatpush3.bf16.msra.mxu0 %v2423_v15  ;;  %v2477_v13 = vpack.c.bf16 %v1218_v12, %v1217_v11  ;;  %v1220_v15 = vld [vmem:[#allocation18 + $0x28] sm:$0xff] }
 0x270   :  { %2425 = vmatprep.subr.bf16.mxu0 %v2954_v6 }
 0x271   :  { %2454 = vmatpush3.bf16.msra.mxu1 %v2453_v5  ;;  %v1027_v5 = vld [vmem:[#allocation15 + $0x78] sm:$0xff] }
 0x272   :  { %2455 = vmatprep.subr.bf16.mxu1 %v2954_v6  ;;  %v2447_v7 = vpack.c.bf16 %v1027_v5, %v1026_v4 }
 0x275   :  { %2457 = vmatpush3.bf16.msra.mxu1 %v2456_v10  ;;  %v2474_v10 = vpack.c.bf16 %v1216_v9, %v1215_v8 }
 0x276   :  { %2458 = vmatprep.subr.bf16.mxu1 %v2954_v6 }
 0x279   :  { %2460 = vmatpush3.bf16.msra.mxu1 %v2459_v16  ;;  %v2480_v16 = vpack.c.bf16 %v1220_v15, %v1219_v14  ;;  %v1401_v14 = vld [vmem:[#allocation21 + $0x8] sm:$0xff] }
 0x27a   :  { %2461 = vmatprep.subr.bf16.mxu1 %v2954_v6 }
 0x27d   :  { %2463 = vmatpush3.bf16.msra.mxu1 %v2462_v19  ;;  %v2498_v19 = vpack.c.bf16 %v1308_v18, %v1307_v17  ;;  %v1403_v17 = vld [vmem:[#allocation21 + $0x18] sm:$0xff] }
 0x27e   :  { %2464 = vmatprep.subr.bf16.mxu1 %v2954_v6 }
 0x281   :  { %2466 = vmatpush3.bf16.msra.mxu1 %v2465_v22  ;;  %v2483_v22 = vpack.c.bf16 %v1222_v21, %v1221_v20 }
 0x282   :  { %2467 = vmatprep.subr.bf16.mxu1 %v2954_v6 }
 0x285   :  { %2469 = vmatpush3.bf16.msra.mxu1 %v2468_v25  ;;  %v2501_v25 = vpack.c.bf16 %v1310_v24, %v1309_v23  ;;  %v1405_v23 = vld [vmem:[#allocation21 + $0x28] sm:$0xff] }
 0x286   :  { %2470 = vmatprep.subr.bf16.mxu1 %v2954_v6 }
 0x289   :  { %2472 = vmatpush3.bf16.msra.mxu1 %v2471_v28  ;;  %v2486_v28 = vpack.c.bf16 %v1224_v27, %v1223_v26  ;;  %v1407_v26 = vld [vmem:[#allocation21 + $0x38] sm:$0xff] }
 0x28a   :  { %2497 = vmatprep.subr.bf16.mxu1 %v2954_v6 }
 0x33f   :  { %v893_v30 = vpop.f32.mrb[0].mxu1 }
 0x340   :  { %899 = vst [vmem:[#allocation4] sm:$0xff] %v893_v30  ;;  %v908_v31 = vadd.f32 %v1683_v29, %v893_v30  ;;  %v2070_v32 = vpop.f32.mrb[1].mxu1  ;;  %v1311_v29 = vld [vmem:[#allocation20 + $0x20] sm:$0xff]  ;;  %v1312_v30 = vld [vmem:[#allocation20 + $0x28] sm:$0xff] }
 0x341   :  { %v1225_v32 = vld [vmem:[#allocation18 + $0x50] sm:$0xff] }
 0x342   :  { %v910_v33 = vmin.f32 %v908_v31, 0.0  ;;  %vm909_vm5 = vcmp.gt.f32.partialorder %v908_v31, 0.0 }
 0x344   :  { %v911_v34 = vmul.f32 1.442695, %v910_v33  ;;  %v1226_v33 = vld [vmem:[#allocation18 + $0x58] sm:$0xff] }
 0x346   :  { %2608 = vpow2.f32 %v911_v34  ;;  %v1313_v34 = vld [vmem:[#allocation20 + $0x30] sm:$0xff] }
 0x350   :  { %v2609_v35 = vpop.eup %2608 }
 0x351   :  { %v1684_v36 = vadd.f32 -1.0, %v2609_v35  ;;  %v2489_v35 = vpack.c.bf16 %v1226_v33, %v1225_v32  ;;  %v1410_v33 = vld [vmem:[#allocation21 + $0x50] sm:$0xff] }
 0x353   :  { %v914_v37 = vsel %vm909_vm5, %v908_v31, %v1684_v36  ;;  %v2504_v31 = vpack.c.bf16 %v1312_v30, %v1311_v29  ;;  %v1314_v36 = vld [vmem:[#allocation20 + $0x38] sm:$0xff]  ;;  %v1408_v30 = vld [vmem:[#allocation21 + $0x40] sm:$0xff] }
 0x354   :  { %915 = vst [vmem:[#allocation2] sm:$0xff] %v914_v37  ;;  %v1227_v37 = vld [vmem:[#allocation18 + $0x60] sm:$0xff]  ;;  %v2507_v39 = vpack.c.bf16 %v1314_v36, %v1313_v34  ;;  %v1411_v34 = vld [vmem:[#allocation21 + $0x58] sm:$0xff] }
 0x355   :  { %v1412_v36 = vld [vmem:[#allocation21 + $0x60] sm:$0xff] }
 0x35b   :  { %v917_v38 = vld [vmem:[#allocation2 + $0x2] sm:$0x3]  ;;  %v1007_v45 = vld [vmem:[#allocation2] sm:$0x3]  ;;  %v1009_v46 = vld [vmem:[#allocation2 + $0x4] sm:$0x3] }
 0x35c   :  { %918 = vst [vmem:[#allocation3 + $0x2] sm:$0x3] %v917_v38  ;;  %v1101_v54 = vld [vmem:[#allocation2 + $0x2] sm:$0x3]  ;;  %v1103_v55 = vld [vmem:[#allocation2 + $0x6] sm:$0x3] }
 0x35d   :  { %v1228_v38 = vld [vmem:[#allocation18 + $0x68] sm:$0xff] }
 0x35e   :  { %v2492_v42 = vpack.c.bf16 %v1228_v38, %v1227_v37  ;;  %v1413_v37 = vld [vmem:[#allocation21 + $0x68] sm:$0xff]  ;;  %v1414_v38 = vld [vmem:[#allocation21 + $0x70] sm:$0xff] }
 0x363   :  { %v919_v44 = vld [vmem:[#allocation3] sm:$0xf] }
 0x364   :  { %2104 = vmatmul.mubr.f32.vlgmr.msra.gmra.mrb[2].mxu0 %v919_v44  ;;  %1008 = vst [vmem:[#allocation3] sm:$0x3] %v1007_v45  ;;  %1010 = vst [vmem:[#allocation3 + $0x2] sm:$0x3] %v1009_v46  ;;  %v1229_v44 = vld [vmem:[#allocation18 + $0x70] sm:$0xff]  ;;  %v1230_v45 = vld [vmem:[#allocation18 + $0x78] sm:$0xff] }
 0x365   :  { %2427 = vmatpush3.bf16.msra.mxu0 %v2426_v41  ;;  %2138 = vmatprep.mubr.msk.f32.mxu0 %vm2955_vm2, %v2953_v0  ;;  %v1316_v41 = vld [vmem:[#allocation20 + $0x48] sm:$0xff]  ;;  %v1317_v46 = vld [vmem:[#allocation20 + $0x50] sm:$0xff]  ;;  %v2495_v48 = vpack.c.bf16 %v1230_v45, %v1229_v44 }
 0x366   :  { %2428 = vmatprep.subr.bf16.mxu0 %v2954_v6  ;;  %v2510_v43 = vpack.c.bf16 %v1316_v41, %v1315_v40  ;;  %v1510_v45 = vld [vmem:[%s3668_s17] sm:$0xff] }
 0x369   :  { %2430 = vmatpush3.bf16.msra.mxu0 %v2429_v47  ;;  %v1318_v47 = vld [vmem:[#allocation20 + $0x58] sm:$0xff] }
 0x36a   :  { %2431 = vmatprep.subr.bf16.mxu0 %v2954_v6  ;;  %v2513_v49 = vpack.c.bf16 %v1318_v47, %v1317_v46  ;;  %v1528_v47 = vld [vmem:[%s3668_s17 + $0x90] sm:$0xff] }
 0x36b   :  { %v1011_v53 = vld [vmem:[#allocation3] sm:$0xf] }
 0x36c   :  { %1102 = vst [vmem:[#allocation3] sm:$0x3] %v1101_v54  ;;  %1104 = vst [vmem:[#allocation3 + $0x2] sm:$0x3] %v1103_v55  ;;  %v1322_v54 = vld [vmem:[#allocation20 + $0x78] sm:$0xff] }
 0x36d   :  { %2433 = vmatpush3.bf16.msra.mxu0 %v2432_v50  ;;  %v1319_v50 = vld [vmem:[#allocation20 + $0x60] sm:$0xff] }
 0x36e   :  { %2434 = vmatprep.subr.bf16.mxu0 %v2954_v6  ;;  %v2516_v52 = vpack.c.bf16 %v1320_v51, %v1319_v50  ;;  %v1512_v50 = vld [vmem:[%s3668_s17 + $0x10] sm:$0xff]  ;;  %v1513_v51 = vld [vmem:[%s3668_s17 + $0x18] sm:$0xff] }
 0x371   :  { %2436 = vmatpush3.bf16.msra.mxu0 %v2435_v56 }
 0x372   :  { %2437 = vmatprep.subr.bf16.mxu0 %v2954_v6 }
 0x373   :  { %v1105_v62 = vld [vmem:[#allocation3] sm:$0xf] }
 0x374   :  { %2174 = vmatmul.mubr.f32.vlgmr.msra.gmra.mrb[2].mxu1 %v1105_v62  ;;  %1211 = vst [vmem:[#allocation3] sm:$0x3] %v2953_v0 }
 0x375   :  { %2439 = vmatpush3.bf16.msra.mxu0 %v2438_v59  ;;  %2243 = vmatprep.mubr.msk.f32.mxu1 %vm2955_vm2, %v2953_v0 }
 0x376   :  { %2440 = vmatprep.subr.bf16.mxu0 %v2954_v6  ;;  %2499 = vmatpush3.bf16.msra.mxu1 %v2498_v19 }
 0x377   :  { %2500 = vmatprep.subr.bf16.mxu1 %v2954_v6 }
 0x379   :  { %2442 = vmatpush3.bf16.msra.mxu0 %v2441_v63 }
 0x37a   :  { %2443 = vmatprep.subr.bf16.mxu0 %v2954_v6  ;;  %2502 = vmatpush3.bf16.msra.mxu1 %v2501_v25  ;;  %v1406_v25 = vld [vmem:[#allocation21 + $0x30] sm:$0xff] }
 0x37b   :  { %2503 = vmatprep.subr.bf16.mxu1 %v2954_v6  ;;  %v2531_v29 = vpack.c.bf16 %v1407_v26, %v1406_v25  ;;  %v1525_v25 = vld [vmem:[%s3668_s17 + $0x78] sm:$0xff] }
 0x37d   :  { %2445 = vmatpush3.bf16.msra.mxu0 %v2444_v3  ;;  %v1685_v3 = vld [vmem:[#allocation23] ss:$0 sm:$0xff] }
 0x37e   :  { %2446 = vmatprep.subr.bf16.mxu0 %v2954_v6  ;;  %2505 = vmatpush3.bf16.msra.mxu1 %v2504_v31  ;;  %v1409_v31 = vld [vmem:[#allocation21 + $0x48] sm:$0xff] }
 0x37f   :  { %2506 = vmatprep.subr.bf16.mxu1 %v2954_v6  ;;  %v2534_v32 = vpack.c.bf16 %v1409_v31, %v1408_v30 }
 0x381   :  { %2448 = vmatpush3.bf16.msra.mxu0 %v2447_v7 }
 0x382   :  { %2473 = vmatprep.subr.bf16.mxu0 %v2954_v6  ;;  %2508 = vmatpush3.bf16.msra.mxu1 %v2507_v39  ;;  %v1415_v39 = vld [vmem:[#allocation21 + $0x78] sm:$0xff] }
 0x383   :  { %2509 = vmatprep.subr.bf16.mxu1 %v2954_v6  ;;  %v2543_v40 = vpack.c.bf16 %v1415_v39, %v1414_v38 }
 0x384   :  { %2139 = vmatmul.mubr.f32.vlgmr.msra.gmra.mrb[4].mxu0 %v1011_v53  ;;  %v1321_v53 = vld [vmem:[#allocation20 + $0x70] sm:$0xff] }
 0x385   :  { %2208 = vmatprep.mubr.msk.f32.mxu0 %vm2955_vm2, %v2953_v0  ;;  %2475 = vmatpush3.bf16.msra.mxu0 %v2474_v10  ;;  %v2519_v55 = vpack.c.bf16 %v1322_v54, %v1321_v53  ;;  %v1530_v53 = vld [vmem:[%s3668_s17 + $0xa0] sm:$0xff]  ;;  %v1531_v54 = vld [vmem:[%s3668_s17 + $0xa8] sm:$0xff] }
 0x386   :  { %2476 = vmatprep.subr.bf16.mxu0 %v2954_v6  ;;  %2511 = vmatpush3.bf16.msra.mxu1 %v2510_v43  ;;  %v1527_v43 = vld [vmem:[%s3668_s17 + $0x88] sm:$0xff] }
 0x387   :  { %2512 = vmatprep.subr.bf16.mxu1 %v2954_v6 }
 0x389   :  { %2478 = vmatpush3.bf16.msra.mxu0 %v2477_v13  ;;  %v1400_v13 = vld [vmem:[#allocation21] sm:$0xff] }
 0x38a   :  { %2479 = vmatprep.subr.bf16.mxu0 %v2954_v6  ;;  %2514 = vmatpush3.bf16.msra.mxu1 %v2513_v49  ;;  %v2522_v15 = vpack.c.bf16 %v1401_v14, %v1400_v13  ;;  %v1521_v13 = vld [vmem:[%s3668_s17 + $0x58] sm:$0xff]  ;;  %v1538_v14 = vld [vmem:[%s3668_s17 + $0xe0] sm:$0xff] }
 0x38b   :  { %2515 = vmatprep.subr.bf16.mxu1 %v2954_v6 }
 0x38d   :  { %2481 = vmatpush3.bf16.msra.mxu0 %v2480_v16  ;;  %v1402_v16 = vld [vmem:[#allocation21 + $0x10] sm:$0xff] }
 0x38e   :  { %2482 = vmatprep.subr.bf16.mxu0 %v2954_v6  ;;  %2517 = vmatpush3.bf16.msra.mxu1 %v2516_v52  ;;  %v2525_v21 = vpack.c.bf16 %v1403_v17, %v1402_v16  ;;  %v2551_v52 = vpack.c.bf16 %v1513_v51, %v1512_v50 }
 0x38f   :  { %2518 = vmatprep.subr.bf16.mxu1 %v2954_v6 }
 0x391   :  { %2484 = vmatpush3.bf16.msra.mxu0 %v2483_v22  ;;  %v1404_v22 = vld [vmem:[#allocation21 + $0x20] sm:$0xff] }
 0x392   :  { %2485 = vmatprep.subr.bf16.mxu0 %v2954_v6  ;;  %2520 = vmatpush3.bf16.msra.mxu1 %v2519_v55  ;;  %v2528_v24 = vpack.c.bf16 %v1405_v23, %v1404_v22  ;;  %v2553_v55 = vpack.c.bf16 %v1531_v54, %v1530_v53 }
 0x395   :  { %2487 = vmatpush3.bf16.msra.mxu0 %v2486_v28 }
 0x396   :  { %2488 = vmatprep.subr.bf16.mxu0 %v2954_v6 }
 0x399   :  { %2490 = vmatpush3.bf16.msra.mxu0 %v2489_v35  ;;  %v2537_v35 = vpack.c.bf16 %v1411_v34, %v1410_v33 }
 0x39a   :  { %2491 = vmatprep.subr.bf16.mxu0 %v2954_v6 }
 0x39d   :  { %2493 = vmatpush3.bf16.msra.mxu0 %v2492_v42  ;;  %v1526_v42 = vld [vmem:[%s3668_s17 + $0x80] sm:$0xff] }
 0x39e   :  { %2494 = vmatprep.subr.bf16.mxu0 %v2954_v6  ;;  %v2545_v44 = vpack.c.bf16 %v1527_v43, %v1526_v42 }
 0x3a0   :  { %2546 = vmatprep.subr.bf16.mxu1 %v2545_v44 }
 0x3a1   :  { %2496 = vmatpush3.bf16.msra.mxu0 %v2495_v48  ;;  %v1529_v48 = vld [vmem:[%s3668_s17 + $0x98] sm:$0xff] }
 0x3a2   :  { %2521 = vmatprep.subr.bf16.mxu0 %v2954_v6  ;;  %v2549_v49 = vpack.c.bf16 %v1529_v48, %v1528_v47  ;;  %v1689_v47 = vld [vmem:[#allocation26] ss:$0 sm:$0xff] }
 0x437   :  { %v1002_v56 = vpop.f32.mrb[2].mxu0 }
 0x438   :  { %1006 = vst [vmem:[#allocation4] sm:$0xf] %v1002_v56  ;;  %v2105_v57 = vpop.f32.mrb[3].mxu0  ;;  %v1514_v56 = vld [vmem:[%s3668_s17 + $0x20] sm:$0xff] }
 0x439   :  { %v1515_v57 = vld [vmem:[%s3668_s17 + $0x28] sm:$0xff] }
 0x43f   :  { %v1098_v61 = vld [vmem:[#allocation4] sm:$0xf] }
 0x447   :  { %v1188_v58 = vpop.f32.mrb[2].mxu1 }
 0x448   :  { %v2175_v59 = vpop.f32.mrb[3].mxu1 }
 0x449   :  { %v1532_v59 = vld [vmem:[%s3668_s17 + $0xb0] sm:$0xff] }
 0x457   :  { %v1094_v60 = vpop.f32.mrb[4].mxu0 }
 0x458   :  { %v1099_v62 = vadd.f32 %v1098_v61, %v1094_v60  ;;  %v2140_v63 = vpop.f32.mrb[5].mxu0  ;;  %v1533_v60 = vld [vmem:[%s3668_s17 + $0xb8] sm:$0xff] }
 0x459   :  { %v2557_v61 = vpack.c.bf16 %v1533_v60, %v1532_v59  ;;  %v1517_v63 = vld [vmem:[%s3668_s17 + $0x38] sm:$0xff] }
 0x45a   :  { %1100 = vst [vmem:[#allocation4] sm:$0xf] %v1099_v62  ;;  %v1516_v62 = vld [vmem:[%s3668_s17 + $0x30] sm:$0xff] }
 0x461   :  { %v1192_v1 = vld [vmem:[#allocation4] sm:$0xf] }
 0x462   :  { %v1193_v2 = vadd.f32 %v1192_v1, %v1188_v58  ;;  %v2555_v58 = vpack.c.bf16 %v1515_v57, %v1514_v56  ;;  %v2559_v1 = vpack.c.bf16 %v1517_v63, %v1516_v62 }
 0x464   :  { %1194 = vst [vmem:[#allocation4] sm:$0xf] %v1193_v2  ;;  %v1534_v2 = vld [vmem:[%s3668_s17 + $0xc0] sm:$0xff] }
 0x46b   :  { %v1195_v4 = vld [vmem:[#allocation4] sm:$0xf] }
 0x46c   :  { %v1203_v5 = vadd.f32 %v1685_v3, %v1195_v4  ;;  %v1535_v3 = vld [vmem:[%s3668_s17 + $0xc8] sm:$0xff]  ;;  %v1518_v4 = vld [vmem:[%s3668_s17 + $0x40] sm:$0xff] }
 0x46e   :  { %v1205_v7 = vmin.f32 %v1203_v5, 0.0  ;;  %vm1204_vm6 = vcmp.gt.f32.partialorder %v1203_v5, 0.0 }
 0x470   :  { %v1206_v8 = vmul.f32 1.442695, %v1205_v7  ;;  %v1519_v7 = vld [vmem:[%s3668_s17 + $0x48] sm:$0xff] }
 0x472   :  { %2610 = vpow2.f32 %v1206_v8  ;;  %v1536_v8 = vld [vmem:[%s3668_s17 + $0xd0] sm:$0xff] }
 0x47c   :  { %v2611_v9 = vpop.eup %2610 }
 0x47d   :  { %v1686_v10 = vadd.f32 -1.0, %v2611_v9  ;;  %v1537_v9 = vld [vmem:[%s3668_s17 + $0xd8] sm:$0xff] }
 0x47f   :  { %v1209_v11 = vsel %vm1204_vm6, %v1203_v5, %v1686_v10  ;;  %v2561_v5 = vpack.c.bf16 %v1535_v3, %v1534_v2  ;;  %v2563_v10 = vpack.c.bf16 %v1519_v7, %v1518_v4 }
 0x480   :  { %1210 = vst [vmem:[#allocation2] sm:$0xf] %v1209_v11  ;;  %v2565_v11 = vpack.c.bf16 %v1537_v9, %v1536_v8 }
 0x487   :  { %v1212_v12 = vld [vmem:[#allocation2] sm:$0x3]  ;;  %v1304_v20 = vld [vmem:[#allocation2 + $0x2] sm:$0x3] }
 0x488   :  { %1213 = vst [vmem:[#allocation3 + $0x2] sm:$0x3] %v1212_v12  ;;  %v1302_v19 = vld [vmem:[#allocation2] sm:$0x3]  ;;  %v1396_v28 = vld [vmem:[#allocation2 + $0x2] sm:$0x3] }
 0x489   :  { %v1520_v12 = vld [vmem:[%s3668_s17 + $0x50] sm:$0xff] }
 0x48a   :  { %v2567_v16 = vpack.c.bf16 %v1521_v13, %v1520_v12 }
 0x48f   :  { %v1214_v18 = vld [vmem:[#allocation3] sm:$0xf] }
 0x490   :  { %2209 = vmatmul.mubr.f32.vlgmr.msra.gmra.mrb[6].mxu0 %v1214_v18  ;;  %1303 = vst [vmem:[#allocation3] sm:$0x3] %v1302_v19  ;;  %1305 = vst [vmem:[#allocation3 + $0x2] sm:$0x3] %v1304_v20  ;;  %v1522_v18 = vld [vmem:[%s3668_s17 + $0x60] sm:$0xff]  ;;  %v1523_v19 = vld [vmem:[%s3668_s17 + $0x68] sm:$0xff] }
 0x491   :  { %2523 = vmatpush3.bf16.msra.mxu0 %v2522_v15  ;;  %2278 = vmatprep.mubr.msk.f32.mxu0 %vm2955_vm2, %v2953_v0  ;;  %v1539_v15 = vld [vmem:[%s3668_s17 + $0xe8] sm:$0xff]  ;;  %v1540_v20 = vld [vmem:[%s3668_s17 + $0xf0] sm:$0xff]  ;;  %v2571_v22 = vpack.c.bf16 %v1523_v19, %v1522_v18 }
 0x492   :  { %2524 = vmatprep.subr.bf16.mxu0 %v2954_v6  ;;  %v2569_v17 = vpack.c.bf16 %v1539_v15, %v1538_v14 }
 0x495   :  { %2526 = vmatpush3.bf16.msra.mxu0 %v2525_v21  ;;  %v1541_v21 = vld [vmem:[%s3668_s17 + $0xf8] sm:$0xff] }
 0x496   :  { %2527 = vmatprep.subr.bf16.mxu0 %v2954_v6  ;;  %v2573_v23 = vpack.c.bf16 %v1541_v21, %v1540_v20 }
 0x497   :  { %v1306_v27 = vld [vmem:[#allocation3] sm:$0xf] }
 0x498   :  { %2244 = vmatmul.mubr.f32.vlgmr.msra.gmra.mrb[4].mxu1 %v1306_v27  ;;  %1398 = vst [vmem:[#allocation3 + $0x2] sm:$0x3] %v2953_v0  ;;  %1397 = vst [vmem:[#allocation3] sm:$0x3] %v1396_v28  ;;  %v2540_v0 = vpack.c.bf16 %v1413_v37, %v1412_v36  ;;  %v1687_v37 = vld [vmem:[#allocation24] ss:$0 sm:$0xff] }
 0x499   :  { %2529 = vmatpush3.bf16.msra.mxu0 %v2528_v24  ;;  %v1524_v24 = vld [vmem:[%s3668_s17 + $0x70] sm:$0xff] }
 0x49a   :  { %2530 = vmatprep.subr.bf16.mxu0 %v2954_v6  ;;  %v2575_v26 = vpack.c.bf16 %v1525_v25, %v1524_v24 }
 0x49d   :  { %2532 = vmatpush3.bf16.msra.mxu0 %v2531_v29 }
 0x49e   :  { %2533 = vmatprep.subr.bf16.mxu0 %v2954_v6 }
 0x49f   :  { %v1399_v41 = vld [vmem:[#allocation3] sm:$0xf] }
 0x4a1   :  { %2535 = vmatpush3.bf16.msra.mxu0 %v2534_v32 }
 0x4a2   :  { %2536 = vmatprep.subr.bf16.mxu0 %v2954_v6 }
 0x4a5   :  { %2538 = vmatpush3.bf16.msra.mxu0 %v2537_v35 }
 0x4a6   :  { %2539 = vmatprep.subr.bf16.mxu0 %v2954_v6 }
 0x4a9   :  { %2541 = vmatpush3.bf16.msra.mxu0 %v2540_v0 }
 0x4aa   :  { %2542 = vmatprep.subr.bf16.mxu0 %v2954_v6  ;;  %v1511_v6 = vld [vmem:[%s3668_s17 + $0x8] sm:$0xff]  ;;  %s2956_s17 = smov [#allocation27]  }
 0x4ab   :  { %v2547_v46 = vpack.c.bf16 %v1511_v6, %v1510_v45  ;;  %s1637_s10 = sshll.u32 %s2956_s17, 4  ;;  %s1638_s10 = int_to_ptr.vmem [resolvable:$true] %s1637_s10 }
 0x4ac   :  { %s2900_s27 = scalar_lea.vmem %s1638_s10, 32  ;;  %p2905_p7 = scmp.lt.s32.totalorder %s1638_s10, %s1638_s10 }
 0x4ad   :  { %2544 = vmatpush3.bf16.msra.mxu0 %v2543_v40  ;;  %2548 = vmatpush3.bf16.msra.mxu1 %v2547_v46  ;;  %p2901_p6 = scmp.ne.s32.totalorder %s1638_s10, %s2900_s27  ;;  %p2906_p8 = scmp.lt.s32.totalorder %s2900_s27, %s2900_s27 }
 0x4ae   :  { %2550 = vmatprep.subr.bf16.mxu1 %v2549_v49 }
 0x4af   :  { %p2907_p9 = por %p2906_p8, %p2905_p7 }
 0x4b0   :  { %2279 = vmatmul.mubr.f32.vlgmr.msra.gmra.mrb[8].mxu0 %v1399_v41 }
 0x4b1   :  { %2552 = vmatpush3.bf16.msra.mxu1 %v2551_v52  ;;  %p2908_p10 = pnand %p2907_p9, %p2901_p6 }
 0x4b2   :  { %2554 = vmatprep.subr.bf16.mxu1 %v2553_v55 }
 0x4b5   :  { %2556 = vmatpush3.bf16.msra.mxu1 %v2555_v58 }
 0x4b6   :  { %2558 = vmatprep.subr.bf16.mxu1 %v2557_v61 }
 0x4b9   :  { %2560 = vmatpush3.bf16.msra.mxu1 %v2559_v1 }
 0x4ba   :  { %2562 = vmatprep.subr.bf16.mxu1 %v2561_v5 }
 0x4bd   :  { %2564 = vmatpush3.bf16.msra.mxu1 %v2563_v10 }
 0x4be   :  { %2566 = vmatprep.subr.bf16.mxu1 %v2565_v11 }
 0x4c1   :  { %2568 = vmatpush3.bf16.msra.mxu1 %v2567_v16 }
 0x4c2   :  { %2570 = vmatprep.subr.bf16.mxu1 %v2569_v17 }
 0x4c5   :  { %2572 = vmatpush3.bf16.msra.mxu1 %v2571_v22 }
 0x4c6   :  { %2574 = vmatprep.subr.bf16.mxu1 %v2573_v23 }
 0x4c9   :  { %2576 = vmatpush3.bf16.msra.mxu1 %v2575_v26 }
 0x563   :  { %v1297_v27 = vpop.f32.mrb[6].mxu0 }
 0x564   :  { %1301 = vst [vmem:[#allocation4] sm:$0xf] %v1297_v27  ;;  %v2210_v28 = vpop.f32.mrb[7].mxu0 }
 0x56b   :  { %v1389_v29 = vpop.f32.mrb[4].mxu1  ;;  %v1393_v30 = vld [vmem:[#allocation4] sm:$0xf] }
 0x56c   :  { %v1394_v31 = vadd.f32 %v1393_v30, %v1389_v29  ;;  %v2245_v32 = vpop.f32.mrb[5].mxu1 }
 0x56e   :  { %1395 = vst [vmem:[#allocation4] sm:$0xf] %v1394_v31 }
 0x575   :  { %v1486_v34 = vld [vmem:[#allocation4] sm:$0xf] }
 0x583   :  { %v1482_v33 = vpop.f32.mrb[8].mxu0 }
 0x584   :  { %v1487_v35 = vadd.f32 %v1486_v34, %v1482_v33  ;;  %v2280_v36 = vpop.f32.mrb[9].mxu0 }
 0x586   :  { %1488 = vst [vmem:[#allocation4] sm:$0xf] %v1487_v35 }
 0x58d   :  { %v1489_v0 = vld [vmem:[#allocation4] sm:$0xf] }
 0x58e   :  { %v1497_v38 = vadd.f32 %v1687_v37, %v1489_v0 }
 0x590   :  { %v1499_v39 = vmin.f32 %v1497_v38, 0.0  ;;  %vm1498_vm7 = vcmp.gt.f32.partialorder %v1497_v38, 0.0 }
 0x592   :  { %v1500_v40 = vmul.f32 1.442695, %v1499_v39 }
 0x594   :  { %2612 = vpow2.f32 %v1500_v40 }
 0x59e   :  { %v2613_v41 = vpop.eup %2612 }
 0x59f   :  { %v1688_v42 = vadd.f32 -1.0, %v2613_v41 }
 0x5a1   :  { %v1503_v43 = vsel %vm1498_vm7, %v1497_v38, %v1688_v42 }
 0x5a2   :  { %1504 = vst [vmem:[#allocation2] sm:$0xf] %v1503_v43 }
 0x5a9   :  { %v1505_v44 = vld [vmem:[#allocation2] sm:$0xf]  }
 0x5aa   :  { %1506 = vst [vmem:[#allocation5] sm:$0xf] %v1505_v44  }
 0x5b1   :  { %v1690_v45 = vld.sshfl [vmem:[#allocation5] sm:$0x33 pattern:$0x76325410] }
 0x5b2   :  { %v1557_v6 = vcombine.high %v1690_v45, %v1690_v45 }
 0x5b4   :  { %1624 = vmatprep.mubr.f32.mxu1 %v1557_v6 }
 0x5b5   :  { %1625 = vmatmul.mubr.f32.vlgmr.msra.gmra.mrb[6].mxu1 %v1690_v45 }
 0x688   :  { %v1906_v46 = vpop.f32.mrb[6].mxu1 }
 0x689   :  { %v1907_v48 = vpop.f32.mrb[7].mxu1 }
 0x68a   :  { %v1908_v49 = vadd.f32 %v1907_v48, %v1906_v46 }
 0x68c   :  { %v1627_v50 = vadd.f32 %v1908_v49, %v1689_v47 }
 0x68e   :  { %1630 = vst [vmem:[#allocation27] sm:$0x3] %v1627_v50 }
 0x68f   :  { %2911 = shalt.err (!%p2908_p10)
}
 0x690   :  { %s3685_s2 = sld [smem:[#allocation40_spill]] }
 0x696   :  { %s2912_s9 = scalar_lea.hbm %s3685_s2, 32 }
 0x697   :  { %p2913_p11 = scmp.ne.s32.totalorder %s3685_s2, %s2912_s9  ;;  %p2916_p12 = scmp.lt.u32.totalorder %s2912_s9, %s3685_s2 }
 0x699   :  { %p2918_p13 = pnand %p2916_p12, %p2913_p11 }
 0x69b   :  { %2921 = shalt.err (!%p2918_p13)
}
 0x69c   :  { %1640 = dma.vmem_to_hbm [thread:$0]  %s1638_s10, 32, %s3685_s2, [#allocation8]  }
 0x69d   :  { %2936 = dma.done.wait [#allocation8], 32  }
 0x69e   :  { %2937 = vsyncadd [#allocation8], 4294967264 }
 0x69f   :  { %1644 = vsyncpa [#allocation7], 1 }
 0x6a0   :  { %1645 = vsyncpa [#allocation10], 1 }
 0x6a1   :  { %1646 = vsyncpa [#allocation13], 1 }
 0x6a2   :  { %1647 = vsyncpa [#allocation16], 1 }
 0x6a3   :  { %1648 = vsyncpa [#allocation19], 1 }
 0x6a4   :  { %1649 = vsyncpa [#allocation22], 1 }
 0x6a5   :  { %1650 = vsyncpa [#allocation25], 1 }
 0x6a6   :  { %1651 = vsyncpa [#allocation8], 1 }

</bundles_post_ra>
